<compile_context>
chip_gen: v7x
topology: tpu7x:2x2x1
jax: 0.10.0
libtpu: 0.0.40
codegen_flags: <defaults>
</compile_context>

<pallas_src>
import functools

import jax
import jax.numpy as jnp
from jax import lax
from jax.experimental import pallas as pl
from jax.experimental.pallas import tpu as pltpu

HIGHEST = jax.lax.Precision.HIGHEST


def mhgat_fused_kernel(xq_ref, xkv_ref, adj_ref, w_all_ref, a1_ref, a2_ref,
                       fcw_ref, fcb_ref, out_ref, *, alpha, nheads, f_out):
    """All GAT heads + masked softmax + ELU + fc projection, one row block."""
    xq = xq_ref[...]                       # (bq, F_in)   query-row block
    xkv = xkv_ref[...]                     # (N,  F_in)   all nodes (key/value side)

    # One wide MXU push per operand for every head's projection.
    wh_q = jnp.dot(xq, w_all_ref[...],
                   preferred_element_type=jnp.float32, precision=HIGHEST)   # (bq, H*F_out)
    wh_kv = jnp.dot(xkv, w_all_ref[...],
                    preferred_element_type=jnp.float32, precision=HIGHEST)  # (N,  H*F_out)

    # Batched attention-vector products (block-diagonal a1/a2):
    #   wh1_all[:, h] = Wh_h(query rows) @ a1_h     -> (bq, H)
    #   wh2_all[h, :] = (Wh_h(all rows) @ a2_h)^T   -> (H, N)
    wh1_all = jnp.dot(wh_q, a1_ref[...],
                      preferred_element_type=jnp.float32, precision=HIGHEST)
    wh2_all = lax.dot_general(a2_ref[...], wh_kv, (((1,), (1,)), ((), ())),
                              preferred_element_type=jnp.float32,
                              precision=HIGHEST)

    # Hoisted adjacency mask as an additive bias (O(1) values vanish next to
    # -9e15 in f32, so `e + bias` == where(adj>0, e, -9e15) exactly).
    bias = jnp.where(adj_ref[...] > 0, 0.0, -9e15).astype(jnp.float32)      # (bq, N)

    heads = []
    for h in range(nheads):                                 # static unroll, nheads tiny
        e = wh1_all[:, h:h + 1] + wh2_all[h:h + 1, :]       # (bq, N)
        e = jnp.maximum(e, alpha * e)                       # LeakyReLU (0 < alpha < 1)
        logits = e + bias

        # masked softmax along rows (self-loops guarantee >=1 unmasked entry
        # per row, same assumption as the PyTorch reference).
        m = jnp.max(logits, axis=1, keepdims=True)
        p = jnp.exp(logits - m)
        s = jnp.sum(p, axis=1, keepdims=True)
        att = p * pl.reciprocal(s, approx=False)            # exact divide (EUP path)
        # (attention dropout is identity in eval mode)

        wh_h = wh_kv[:, h * f_out:(h + 1) * f_out]          # (N, F_out) static lane slice
        h_prime = jnp.dot(att, wh_h,
                          preferred_element_type=jnp.float32, precision=HIGHEST)

        # ELU (concat=True path).  exp(x)-1 vs expm1(x): |diff| <~ 1e-7 here.
        # TODO(synk): switch to jnp.expm1 if/when Mosaic guarantees a lowering.
        heads.append(jnp.where(h_prime > 0, h_prime, jnp.exp(h_prime) - 1.0))

    # Single wide fc matmul on the lane-packed head concat (K = H*F_out).
    elu_all = jnp.concatenate(heads, axis=1)                # (bq, H*F_out)
    out = jnp.dot(elu_all, fcw_ref[...],
                  preferred_element_type=jnp.float32, precision=HIGHEST)
    out_ref[...] = out + fcb_ref[...]                       # lane-dense (bq, F_in) store


def mhgat_forward(x, adj, W_stack, a_stack, fc_w, fc_b, *, alpha,
                  block_rows=None):
    nheads, F_in, F_out = W_stack.shape
    N = x.shape[0]
    HF = nheads * F_out

    if block_rows is None:
        block_rows = N if (N <= 128 or N % 128 != 0) else 128
    assert N % block_rows == 0
    assert block_rows == N or block_rows % 8 == 0

    # ---- host-side parameter packing (done once) ----
    # W_all[:, h*F_out:(h+1)*F_out] == W_stack[h]  -> one (F_in, H*F_out) matmul.
    W_all = jnp.transpose(W_stack, (1, 0, 2)).reshape(F_in, HF)
    eye = jnp.eye(nheads, dtype=W_stack.dtype)
    # Block-diagonal attention vectors: A1 (H*F_out, H), A2 (H, H*F_out).
    A1 = (a_stack[:, 0, :, None] * eye[:, None, :]).reshape(HF, nheads)
    A2 = (eye[:, :, None] * a_stack[None, :, 1, :][0][None, :, :] if False
          else (eye[:, :, None] * a_stack[:, 1, :][None, :, :]).reshape(nheads, HF))
    fc_b2 = fc_b.reshape(1, F_in)

    kernel = functools.partial(mhgat_fused_kernel, alpha=alpha,
                               nheads=nheads, f_out=F_out)

    grid = (N // block_rows,)
    return pl.pallas_call(
        kernel,
        out_shape=jax.ShapeDtypeStruct((N, F_in), jnp.float32),
        grid=grid,
        in_specs=[
            pl.BlockSpec((block_rows, F_in), lambda i: (i, 0)),   # x (query rows)
            pl.BlockSpec((N, F_in), lambda i: (0, 0)),            # x (all nodes)
            pl.BlockSpec((block_rows, N), lambda i: (i, 0)),      # adj rows
            pl.BlockSpec((F_in, HF), lambda i: (0, 0)),           # W_all
            pl.BlockSpec((HF, nheads), lambda i: (0, 0)),         # A1 (block-diag)
            pl.BlockSpec((nheads, HF), lambda i: (0, 0)),         # A2 (block-diag)
            pl.BlockSpec((HF, F_in), lambda i: (0, 0)),           # fc_w
            pl.BlockSpec((1, F_in), lambda i: (0, 0)),            # fc_b
        ],
        out_specs=pl.BlockSpec((block_rows, F_in), lambda i: (i, 0)),
        compiler_params=pltpu.CompilerParams(
            dimension_semantics=("parallel",)),
    )(x, x, adj, W_all, A1, A2, fc_w, fc_b2)


def mhgat_reference(x, adj, W_stack, a_stack, fc_w, fc_b, *, alpha):
    """Pure-JAX reference mirroring the PyTorch forward (eval mode)."""
    outs = []
    for h in range(W_stack.shape[0]):
        Wh = jnp.dot(x, W_stack[h], precision=HIGHEST)
        wh1 = jnp.dot(Wh, a_stack[h, 0][:, None], precision=HIGHEST)   # (N, 1)
        wh2 = jnp.dot(Wh, a_stack[h, 1][:, None], precision=HIGHEST)   # (N, 1)
        e = wh1 + wh2.T
        e = jnp.where(e > 0, e, alpha * e)
        logits = jnp.where(adj > 0, e, -9e15)
        att = jax.nn.softmax(logits, axis=1)
        hp = jnp.dot(att, Wh, precision=HIGHEST)
        outs.append(jnp.where(hp > 0, hp, jnp.expm1(hp)))
    h_cat = jnp.concatenate(outs, axis=1)
    return jnp.dot(h_cat, fc_w, precision=HIGHEST) + fc_b


if __name__ == "__main__":
    # small shapes consistent with the module
    N = 16                 # number of graph nodes
    input_feat_dim = 32
    output_feat_dim = 8
    nheads = 4
    alpha = 0.2
    # dropout = 0.5 -> identity in eval mode (training=False)

    key = jax.random.PRNGKey(0)
    kx, kadj, kw, ka, kfw, kfb = jax.random.split(key, 6)

    x = jax.random.normal(kx, (N, input_feat_dim), dtype=jnp.float32)
    # random symmetric adjacency with self loops, then "to_dense" float matrix
    a_rand = jax.random.uniform(kadj, (N, N))
    adj = ((a_rand + a_rand.T) * 0.5 > 0.7).astype(jnp.float32)
    adj = jnp.maximum(adj, jnp.eye(N, dtype=jnp.float32))

    # deterministic parameter init (xavier-ish scale)
    W_stack = jax.random.normal(
        kw, (nheads, input_feat_dim, output_feat_dim), dtype=jnp.float32) * 0.2
    a_stack = jax.random.normal(
        ka, (nheads, 2, output_feat_dim), dtype=jnp.float32) * 0.2
    fc_w = jax.random.normal(
        kfw, (nheads * output_feat_dim, input_feat_dim), dtype=jnp.float32) * 0.2
    fc_b = jax.random.normal(kfb, (1, input_feat_dim), dtype=jnp.float32) * 0.1

    out = mhgat_forward(x, adj, W_stack, a_stack, fc_w, fc_b, alpha=alpha)
    out = jax.block_until_ready(out)

    ref = mhgat_reference(x, adj, W_stack, a_stack, fc_w, fc_b, alpha=alpha)
    assert out.shape == (N, input_feat_dim)
    assert jnp.allclose(out, ref, atol=1e-3, rtol=1e-3), (
        float(jnp.max(jnp.abs(out - ref))))

    print("KERNEL_OK")
</pallas_src>

<mosaic_0001>
module attributes {stable_mosaic.version = 11 : i64} {
  func.func @mhgat_fused_kernel(%arg0: i32, %arg1: memref<16x32xf32, #tpu.memory_space<vmem>>, %arg2: memref<16x32xf32, #tpu.memory_space<vmem>>, %arg3: memref<16x16xf32, #tpu.memory_space<vmem>>, %arg4: memref<32x32xf32, #tpu.memory_space<vmem>>, %arg5: memref<32x4xf32, #tpu.memory_space<vmem>>, %arg6: memref<4x32xf32, #tpu.memory_space<vmem>>, %arg7: memref<32x32xf32, #tpu.memory_space<vmem>>, %arg8: memref<1x32xf32, #tpu.memory_space<vmem>>, %arg9: memref<16x32xf32, #tpu.memory_space<vmem>>) attributes {dimension_semantics = [#tpu.dimension_semantics<parallel>], iteration_bounds = array<i64: 1>, scalar_prefetch = 0 : i64, scratch_operands = 0 : i64, tpu.core_type = #tpu.core_type<tc>, window_params = [{transform_indices = @transform_0, window_bounds = array<i64: 16, 32>}, {pipeline_mode = #tpu.pipeline_mode<synchronous>, transform_indices = @transform_1, window_bounds = array<i64: 16, 32>}, {transform_indices = @transform_2, window_bounds = array<i64: 16, 16>}, {pipeline_mode = #tpu.pipeline_mode<synchronous>, transform_indices = @transform_3, window_bounds = array<i64: 32, 32>}, {pipeline_mode = #tpu.pipeline_mode<synchronous>, transform_indices = @transform_4, window_bounds = array<i64: 32, 4>}, {pipeline_mode = #tpu.pipeline_mode<synchronous>, transform_indices = @transform_5, window_bounds = array<i64: 4, 32>}, {pipeline_mode = #tpu.pipeline_mode<synchronous>, transform_indices = @transform_6, window_bounds = array<i64: 32, 32>}, {pipeline_mode = #tpu.pipeline_mode<synchronous>, transform_indices = @transform_7, window_bounds = array<i64: 1, 32>}, {transform_indices = @transform_8, window_bounds = array<i64: 16, 32>}]} {
    %c0 = arith.constant 0 : index
    %c0_0 = arith.constant 0 : index
    %0 = vector.load %arg1[%c0, %c0_0] : memref<16x32xf32, #tpu.memory_space<vmem>>, vector<16x32xf32>
    %c0_1 = arith.constant 0 : index
    %c0_2 = arith.constant 0 : index
    %1 = vector.load %arg2[%c0_1, %c0_2] : memref<16x32xf32, #tpu.memory_space<vmem>>, vector<16x32xf32>
    %c0_3 = arith.constant 0 : index
    %c0_4 = arith.constant 0 : index
    %2 = vector.load %arg4[%c0_3, %c0_4] : memref<32x32xf32, #tpu.memory_space<vmem>>, vector<32x32xf32>
    %cst = arith.constant dense<0.000000e+00> : vector<16x32xf32>
    %3 = tpu.matmul %0, %2, %cst {dimension_numbers = #tpu.dot_dimension_numbers<[1], [0], [0], [1], [0, 0, 1, 1], [], []>, precision = #tpu.contract_precision<fp32>} : vector<16x32xf32>, vector<32x32xf32>, vector<16x32xf32> -> vector<16x32xf32>
    %c0_5 = arith.constant 0 : index
    %c0_6 = arith.constant 0 : index
    %4 = vector.load %arg4[%c0_5, %c0_6] : memref<32x32xf32, #tpu.memory_space<vmem>>, vector<32x32xf32>
    %cst_7 = arith.constant dense<0.000000e+00> : vector<16x32xf32>
    %5 = tpu.matmul %1, %4, %cst_7 {dimension_numbers = #tpu.dot_dimension_numbers<[1], [0], [0], [1], [0, 0, 1, 1], [], []>, precision = #tpu.contract_precision<fp32>} : vector<16x32xf32>, vector<32x32xf32>, vector<16x32xf32> -> vector<16x32xf32>
    %c0_8 = arith.constant 0 : index
    %c0_9 = arith.constant 0 : index
    %6 = vector.load %arg5[%c0_8, %c0_9] : memref<32x4xf32, #tpu.memory_space<vmem>>, vector<32x4xf32>
    %cst_10 = arith.constant dense<0.000000e+00> : vector<16x4xf32>
    %7 = tpu.matmul %3, %6, %cst_10 {dimension_numbers = #tpu.dot_dimension_numbers<[1], [0], [0], [1], [0, 0, 1, 1], [], []>, precision = #tpu.contract_precision<fp32>} : vector<16x32xf32>, vector<32x4xf32>, vector<16x4xf32> -> vector<16x4xf32>
    %c0_11 = arith.constant 0 : index
    %c0_12 = arith.constant 0 : index
    %8 = vector.load %arg6[%c0_11, %c0_12] : memref<4x32xf32, #tpu.memory_space<vmem>>, vector<4x32xf32>
    %cst_13 = arith.constant dense<0.000000e+00> : vector<4x16xf32>
    %9 = tpu.matmul %8, %5, %cst_13 {dimension_numbers = #tpu.dot_dimension_numbers<[1], [1], [0], [0], [0, 0, 1, 0], [], []>, precision = #tpu.contract_precision<fp32>} : vector<4x32xf32>, vector<16x32xf32>, vector<4x16xf32> -> vector<4x16xf32>
    %c0_14 = arith.constant 0 : index
    %c0_15 = arith.constant 0 : index
    %10 = vector.load %arg3[%c0_14, %c0_15] : memref<16x16xf32, #tpu.memory_space<vmem>>, vector<16x16xf32>
    %cst_16 = arith.constant 0.000000e+00 : f32
    %11 = vector.broadcast %cst_16 : f32 to vector<16x16xf32>
    %12 = arith.cmpf ogt, %10, %11 : vector<16x16xf32>
    %cst_17 = arith.constant 0.000000e+00 : f32
    %cst_18 = arith.constant -9.000000e+15 : f32
    %13 = vector.broadcast %cst_17 : f32 to vector<16x16xf32>
    %14 = vector.broadcast %cst_18 : f32 to vector<16x16xf32>
    %15 = arith.select %12, %13, %14 : vector<16x16xi1>, vector<16x16xf32>
    %16 = vector.extract_strided_slice %7 {offsets = [0, 0], sizes = [16, 1], strides = [1, 1]} : vector<16x4xf32> to vector<16x1xf32>
    %17 = vector.extract_strided_slice %9 {offsets = [0, 0], sizes = [1, 16], strides = [1, 1]} : vector<4x16xf32> to vector<1x16xf32>
    %18 = vector.broadcast %16 : vector<16x1xf32> to vector<16x16xf32>
    %19 = vector.broadcast %17 : vector<1x16xf32> to vector<16x16xf32>
    %20 = arith.addf %18, %19 : vector<16x16xf32>
    %cst_19 = arith.constant 2.000000e-01 : f32
    %21 = vector.broadcast %cst_19 : f32 to vector<16x16xf32>
    %22 = arith.mulf %21, %20 : vector<16x16xf32>
    %23 = arith.maximumf %20, %22 : vector<16x16xf32>
    %24 = arith.addf %23, %15 : vector<16x16xf32>
    %cst_20 = arith.constant dense<0xFF800000> : vector<16xf32>
    %25 = vector.multi_reduction <maximumf>, %24, %cst_20 [1] : vector<16x16xf32> to vector<16xf32>
    %26 = vector.shape_cast %25 : vector<16xf32> to vector<16x1xf32>
    %27 = vector.broadcast %26 : vector<16x1xf32> to vector<16x16xf32>
    %28 = arith.subf %24, %27 : vector<16x16xf32>
    %29 = math.exp %28 : vector<16x16xf32>
    %cst_21 = arith.constant dense<0.000000e+00> : vector<16xf32>
    %30 = vector.multi_reduction <add>, %29, %cst_21 [1] : vector<16x16xf32> to vector<16xf32>
    %31 = vector.shape_cast %30 : vector<16xf32> to vector<16x1xf32>
    %32 = tpu.reciprocal %31 : vector<16x1xf32> -> vector<16x1xf32>
    %33 = vector.broadcast %32 : vector<16x1xf32> to vector<16x16xf32>
    %34 = arith.mulf %29, %33 : vector<16x16xf32>
    %35 = vector.extract_strided_slice %5 {offsets = [0, 0], sizes = [16, 8], strides = [1, 1]} : vector<16x32xf32> to vector<16x8xf32>
    %cst_22 = arith.constant dense<0.000000e+00> : vector<16x8xf32>
    %36 = tpu.matmul %34, %35, %cst_22 {dimension_numbers = #tpu.dot_dimension_numbers<[1], [0], [0], [1], [0, 0, 1, 1], [], []>, precision = #tpu.contract_precision<fp32>} : vector<16x16xf32>, vector<16x8xf32>, vector<16x8xf32> -> vector<16x8xf32>
    %cst_23 = arith.constant 0.000000e+00 : f32
    %37 = vector.broadcast %cst_23 : f32 to vector<16x8xf32>
    %38 = arith.cmpf ogt, %36, %37 : vector<16x8xf32>
    %39 = math.exp %36 : vector<16x8xf32>
    %cst_24 = arith.constant 1.000000e+00 : f32
    %40 = vector.broadcast %cst_24 : f32 to vector<16x8xf32>
    %41 = arith.subf %39, %40 : vector<16x8xf32>
    %42 = arith.select %38, %36, %41 : vector<16x8xi1>, vector<16x8xf32>
    %43 = vector.extract_strided_slice %7 {offsets = [0, 1], sizes = [16, 1], strides = [1, 1]} : vector<16x4xf32> to vector<16x1xf32>
    %44 = vector.extract_strided_slice %9 {offsets = [1, 0], sizes = [1, 16], strides = [1, 1]} : vector<4x16xf32> to vector<1x16xf32>
    %45 = vector.broadcast %43 : vector<16x1xf32> to vector<16x16xf32>
    %46 = vector.broadcast %44 : vector<1x16xf32> to vector<16x16xf32>
    %47 = arith.addf %45, %46 : vector<16x16xf32>
    %cst_25 = arith.constant 2.000000e-01 : f32
    %48 = vector.broadcast %cst_25 : f32 to vector<16x16xf32>
    %49 = arith.mulf %48, %47 : vector<16x16xf32>
    %50 = arith.maximumf %47, %49 : vector<16x16xf32>
    %51 = arith.addf %50, %15 : vector<16x16xf32>
    %cst_26 = arith.constant dense<0xFF800000> : vector<16xf32>
    %52 = vector.multi_reduction <maximumf>, %51, %cst_26 [1] : vector<16x16xf32> to vector<16xf32>
    %53 = vector.shape_cast %52 : vector<16xf32> to vector<16x1xf32>
    %54 = vector.broadcast %53 : vector<16x1xf32> to vector<16x16xf32>
    %55 = arith.subf %51, %54 : vector<16x16xf32>
    %56 = math.exp %55 : vector<16x16xf32>
    %cst_27 = arith.constant dense<0.000000e+00> : vector<16xf32>
    %57 = vector.multi_reduction <add>, %56, %cst_27 [1] : vector<16x16xf32> to vector<16xf32>
    %58 = vector.shape_cast %57 : vector<16xf32> to vector<16x1xf32>
    %59 = tpu.reciprocal %58 : vector<16x1xf32> -> vector<16x1xf32>
    %60 = vector.broadcast %59 : vector<16x1xf32> to vector<16x16xf32>
    %61 = arith.mulf %56, %60 : vector<16x16xf32>
    %62 = vector.extract_strided_slice %5 {offsets = [0, 8], sizes = [16, 8], strides = [1, 1]} : vector<16x32xf32> to vector<16x8xf32>
    %cst_28 = arith.constant dense<0.000000e+00> : vector<16x8xf32>
    %63 = tpu.matmul %61, %62, %cst_28 {dimension_numbers = #tpu.dot_dimension_numbers<[1], [0], [0], [1], [0, 0, 1, 1], [], []>, precision = #tpu.contract_precision<fp32>} : vector<16x16xf32>, vector<16x8xf32>, vector<16x8xf32> -> vector<16x8xf32>
    %cst_29 = arith.constant 0.000000e+00 : f32
    %64 = vector.broadcast %cst_29 : f32 to vector<16x8xf32>
    %65 = arith.cmpf ogt, %63, %64 : vector<16x8xf32>
    %66 = math.exp %63 : vector<16x8xf32>
    %cst_30 = arith.constant 1.000000e+00 : f32
    %67 = vector.broadcast %cst_30 : f32 to vector<16x8xf32>
    %68 = arith.subf %66, %67 : vector<16x8xf32>
    %69 = arith.select %65, %63, %68 : vector<16x8xi1>, vector<16x8xf32>
    %70 = vector.extract_strided_slice %7 {offsets = [0, 2], sizes = [16, 1], strides = [1, 1]} : vector<16x4xf32> to vector<16x1xf32>
    %71 = vector.extract_strided_slice %9 {offsets = [2, 0], sizes = [1, 16], strides = [1, 1]} : vector<4x16xf32> to vector<1x16xf32>
    %72 = vector.broadcast %70 : vector<16x1xf32> to vector<16x16xf32>
    %73 = vector.broadcast %71 : vector<1x16xf32> to vector<16x16xf32>
    %74 = arith.addf %72, %73 : vector<16x16xf32>
    %cst_31 = arith.constant 2.000000e-01 : f32
    %75 = vector.broadcast %cst_31 : f32 to vector<16x16xf32>
    %76 = arith.mulf %75, %74 : vector<16x16xf32>
    %77 = arith.maximumf %74, %76 : vector<16x16xf32>
    %78 = arith.addf %77, %15 : vector<16x16xf32>
    %cst_32 = arith.constant dense<0xFF800000> : vector<16xf32>
    %79 = vector.multi_reduction <maximumf>, %78, %cst_32 [1] : vector<16x16xf32> to vector<16xf32>
    %80 = vector.shape_cast %79 : vector<16xf32> to vector<16x1xf32>
    %81 = vector.broadcast %80 : vector<16x1xf32> to vector<16x16xf32>
    %82 = arith.subf %78, %81 : vector<16x16xf32>
    %83 = math.exp %82 : vector<16x16xf32>
    %cst_33 = arith.constant dense<0.000000e+00> : vector<16xf32>
    %84 = vector.multi_reduction <add>, %83, %cst_33 [1] : vector<16x16xf32> to vector<16xf32>
    %85 = vector.shape_cast %84 : vector<16xf32> to vector<16x1xf32>
    %86 = tpu.reciprocal %85 : vector<16x1xf32> -> vector<16x1xf32>
    %87 = vector.broadcast %86 : vector<16x1xf32> to vector<16x16xf32>
    %88 = arith.mulf %83, %87 : vector<16x16xf32>
    %89 = vector.extract_strided_slice %5 {offsets = [0, 16], sizes = [16, 8], strides = [1, 1]} : vector<16x32xf32> to vector<16x8xf32>
    %cst_34 = arith.constant dense<0.000000e+00> : vector<16x8xf32>
    %90 = tpu.matmul %88, %89, %cst_34 {dimension_numbers = #tpu.dot_dimension_numbers<[1], [0], [0], [1], [0, 0, 1, 1], [], []>, precision = #tpu.contract_precision<fp32>} : vector<16x16xf32>, vector<16x8xf32>, vector<16x8xf32> -> vector<16x8xf32>
    %cst_35 = arith.constant 0.000000e+00 : f32
    %91 = vector.broadcast %cst_35 : f32 to vector<16x8xf32>
    %92 = arith.cmpf ogt, %90, %91 : vector<16x8xf32>
    %93 = math.exp %90 : vector<16x8xf32>
    %cst_36 = arith.constant 1.000000e+00 : f32
    %94 = vector.broadcast %cst_36 : f32 to vector<16x8xf32>
    %95 = arith.subf %93, %94 : vector<16x8xf32>
    %96 = arith.select %92, %90, %95 : vector<16x8xi1>, vector<16x8xf32>
    %97 = vector.extract_strided_slice %7 {offsets = [0, 3], sizes = [16, 1], strides = [1, 1]} : vector<16x4xf32> to vector<16x1xf32>
    %98 = vector.extract_strided_slice %9 {offsets = [3, 0], sizes = [1, 16], strides = [1, 1]} : vector<4x16xf32> to vector<1x16xf32>
    %99 = vector.broadcast %97 : vector<16x1xf32> to vector<16x16xf32>
    %100 = vector.broadcast %98 : vector<1x16xf32> to vector<16x16xf32>
    %101 = arith.addf %99, %100 : vector<16x16xf32>
    %cst_37 = arith.constant 2.000000e-01 : f32
    %102 = vector.broadcast %cst_37 : f32 to vector<16x16xf32>
    %103 = arith.mulf %102, %101 : vector<16x16xf32>
    %104 = arith.maximumf %101, %103 : vector<16x16xf32>
    %105 = arith.addf %104, %15 : vector<16x16xf32>
    %cst_38 = arith.constant dense<0xFF800000> : vector<16xf32>
    %106 = vector.multi_reduction <maximumf>, %105, %cst_38 [1] : vector<16x16xf32> to vector<16xf32>
    %107 = vector.shape_cast %106 : vector<16xf32> to vector<16x1xf32>
    %108 = vector.broadcast %107 : vector<16x1xf32> to vector<16x16xf32>
    %109 = arith.subf %105, %108 : vector<16x16xf32>
    %110 = math.exp %109 : vector<16x16xf32>
    %cst_39 = arith.constant dense<0.000000e+00> : vector<16xf32>
    %111 = vector.multi_reduction <add>, %110, %cst_39 [1] : vector<16x16xf32> to vector<16xf32>
    %112 = vector.shape_cast %111 : vector<16xf32> to vector<16x1xf32>
    %113 = tpu.reciprocal %112 : vector<16x1xf32> -> vector<16x1xf32>
    %114 = vector.broadcast %113 : vector<16x1xf32> to vector<16x16xf32>
    %115 = arith.mulf %110, %114 : vector<16x16xf32>
    %116 = vector.extract_strided_slice %5 {offsets = [0, 24], sizes = [16, 8], strides = [1, 1]} : vector<16x32xf32> to vector<16x8xf32>
    %cst_40 = arith.constant dense<0.000000e+00> : vector<16x8xf32>
    %117 = tpu.matmul %115, %116, %cst_40 {dimension_numbers = #tpu.dot_dimension_numbers<[1], [0], [0], [1], [0, 0, 1, 1], [], []>, precision = #tpu.contract_precision<fp32>} : vector<16x16xf32>, vector<16x8xf32>, vector<16x8xf32> -> vector<16x8xf32>
    %cst_41 = arith.constant 0.000000e+00 : f32
    %118 = vector.broadcast %cst_41 : f32 to vector<16x8xf32>
    %119 = arith.cmpf ogt, %117, %118 : vector<16x8xf32>
    %120 = math.exp %117 : vector<16x8xf32>
    %cst_42 = arith.constant 1.000000e+00 : f32
    %121 = vector.broadcast %cst_42 : f32 to vector<16x8xf32>
    %122 = arith.subf %120, %121 : vector<16x8xf32>
    %123 = arith.select %119, %117, %122 : vector<16x8xi1>, vector<16x8xf32>
    %124 = tpu.concatenate %42, %69, %96, %123 in 1 : vector<16x8xf32>, vector<16x8xf32>, vector<16x8xf32>, vector<16x8xf32> -> vector<16x32xf32>
    %c0_43 = arith.constant 0 : index
    %c0_44 = arith.constant 0 : index
    %125 = vector.load %arg7[%c0_43, %c0_44] : memref<32x32xf32, #tpu.memory_space<vmem>>, vector<32x32xf32>
    %cst_45 = arith.constant dense<0.000000e+00> : vector<16x32xf32>
    %126 = tpu.matmul %124, %125, %cst_45 {dimension_numbers = #tpu.dot_dimension_numbers<[1], [0], [0], [1], [0, 0, 1, 1], [], []>, precision = #tpu.contract_precision<fp32>} : vector<16x32xf32>, vector<32x32xf32>, vector<16x32xf32> -> vector<16x32xf32>
    %c0_46 = arith.constant 0 : index
    %c0_47 = arith.constant 0 : index
    %127 = vector.load %arg8[%c0_46, %c0_47] : memref<1x32xf32, #tpu.memory_space<vmem>>, vector<1x32xf32>
    %128 = vector.broadcast %127 : vector<1x32xf32> to vector<16x32xf32>
    %129 = arith.addf %126, %128 : vector<16x32xf32>
    %c0_48 = arith.constant 0 : index
    %c0_49 = arith.constant 0 : index
    %130 = vector.load %arg9[%c0_48, %c0_49] : memref<16x32xf32, #tpu.memory_space<vmem>>, vector<16x32xf32>
    tpu.vector_store %arg9[%c0_48, %c0_49], %129 {strides = array<i32>} : memref<16x32xf32, #tpu.memory_space<vmem>>, vector<16x32xf32>,
    return
  }
  func.func @transform_0(%arg0: i32) -> (i32, i32) {
    %c0_i32 = arith.constant 0 : i32
    %c0_i32_0 = arith.constant 0 : i32
    return %arg0, %c0_i32 : i32, i32
  }
  func.func @transform_1(%arg0: i32) -> (i32, i32) {
    %c0_i32 = arith.constant 0 : i32
    %c0_i32_0 = arith.constant 0 : i32
    %c0_i32_1 = arith.constant 0 : i32
    return %c0_i32, %c0_i32_0 : i32, i32
  }
  func.func @transform_2(%arg0: i32) -> (i32, i32) {
    %c0_i32 = arith.constant 0 : i32
    %c0_i32_0 = arith.constant 0 : i32
    return %arg0, %c0_i32 : i32, i32
  }
  func.func @transform_3(%arg0: i32) -> (i32, i32) {
    %c0_i32 = arith.constant 0 : i32
    %c0_i32_0 = arith.constant 0 : i32
    %c0_i32_1 = arith.constant 0 : i32
    return %c0_i32, %c0_i32_0 : i32, i32
  }
  func.func @transform_4(%arg0: i32) -> (i32, i32) {
    %c0_i32 = arith.constant 0 : i32
    %c0_i32_0 = arith.constant 0 : i32
    %c0_i32_1 = arith.constant 0 : i32
    return %c0_i32, %c0_i32_0 : i32, i32
  }
  func.func @transform_5(%arg0: i32) -> (i32, i32) {
    %c0_i32 = arith.constant 0 : i32
    %c0_i32_0 = arith.constant 0 : i32
    %c0_i32_1 = arith.constant 0 : i32
    return %c0_i32, %c0_i32_0 : i32, i32
  }
  func.func @transform_6(%arg0: i32) -> (i32, i32) {
    %c0_i32 = arith.constant 0 : i32
    %c0_i32_0 = arith.constant 0 : i32
    %c0_i32_1 = arith.constant 0 : i32
    return %c0_i32, %c0_i32_0 : i32, i32
  }
  func.func @transform_7(%arg0: i32) -> (i32, i32) {
    %c0_i32 = arith.constant 0 : i32
    %c0_i32_0 = arith.constant 0 : i32
    %c0_i32_1 = arith.constant 0 : i32
    return %c0_i32, %c0_i32_0 : i32, i32
  }
  func.func @transform_8(%arg0: i32) -> (i32, i32) {
    %c0_i32 = arith.constant 0 : i32
    %c0_i32_0 = arith.constant 0 : i32
    return %arg0, %c0_i32 : i32, i32
  }
}

</mosaic_0001>

<bundles_post_ra>
// kernel: tpu_custom_call.1
= control target key start
LH: loop header
LB: loop body
LE: loop exit
PB: predicated region body
PF: predicated region fallthrough
CT: control target
= control target key end

     0   :  { %13 = vsyncpa [#allocation3], 0  ;;  %s6915_s0 = inlined_call_operand.hbm [shape: f32[16,32], index: 0, kind: input, shape index: {}]   ;;  %s6916_s1 = inlined_call_operand.hbm [shape: f32[16,32], index: 1, kind: input, shape index: {}]   ;;  %s6917_s2 = inlined_call_operand.hbm [shape: f32[16,16], index: 2, kind: input, shape index: {}]   ;;  %s6918_s3 = inlined_call_operand.vmem [shape: f32[32,32], index: 3, kind: input, shape index: {}]   ;;  %s6919_s4 = inlined_call_operand.vmem [shape: f32[32,4], index: 4, kind: input, shape index: {}]   ;;  %s6920_s5 = inlined_call_operand.vmem [shape: f32[4,32], index: 5, kind: input, shape index: {}]   ;;  %s6921_s6 = inlined_call_operand.hbm [shape: f32[32,32], index: 6, kind: input, shape index: {}]   ;;  %s6922_s7 = inlined_call_operand.vmem [shape: f32[1,32], index: 7, kind: input, shape index: {}]   ;;  %s6923_s8 = inlined_call_operand.hbm [shape: f32[16,32], index: 8, kind: output, shape index: {}]  }
   0x1   :  { %14 = vsyncpa [#allocation6], 0 }
   0x2   :  { %15 = vsyncpa [#allocation9], 0 }
   0x3   :  { %16 = vsyncpa [#allocation4], 0  ;;  %s6366_s27 = smov [#allocation5]   ;;  %s6367_s29 = smov [#allocation2]  }
   0x4   :  { %s34_s28 = sshll.u32 %s6366_s27, 4  ;;  %s22_s30 = sshll.u32 %s6367_s29, 4  ;;  %s35_s28 = int_to_ptr.vmem [resolvable:$true] %s34_s28  ;;  %s6431_s30 = int_to_ptr.vmem [resolvable:$true] %s22_s30 }
   0x5   :  { %s6248_s11 = scalar_lea.hbm %s6916_s1, 256 }
   0x6   :  { %p6249_p0 = scmp.ne.s32.totalorder %s6916_s1, %s6248_s11  ;;  %p6252_p1 = scmp.lt.u32.totalorder %s6248_s11, %s6916_s1 }
   0x8   :  { %p6254_p2 = pnand %p6252_p1, %p6249_p0 }
   0xa   :  { %6257 = shalt.err (!%p6254_p2)
}
   0xb   :  { %s6258_s16 = scalar_lea.vmem %s35_s28, 256  ;;  %p6263_p4 = scmp.lt.s32.totalorder %s35_s28, %s35_s28 }
   0xc   :  { %p6259_p3 = scmp.ne.s32.totalorder %s35_s28, %s6258_s16  ;;  %p6264_p5 = scmp.lt.s32.totalorder %s6258_s16, %s6258_s16 }
   0xe   :  { %p6265_p6 = por %p6264_p5, %p6263_p4 }
  0x10   :  { %p6266_p7 = pnand %p6265_p6, %p6259_p3 }
  0x12   :  { %6269 = shalt.err (!%p6266_p7)
}
  0x13   :  { %s6368_s17 = smov 128   ;;  %s6369_s18 = smov 8  }
  0x14   :  { %40 = dma.hbm_to_vmem [thread:$0]  %s6916_s1, 256, %s35_s28, [#allocation6], %s6368_s17, %s6368_s17, %s6369_s18  }
  0x15   :  { %s6270_s23 = scalar_lea.hbm %s6915_s0, 256 }
  0x16   :  { %p6271_p8 = scmp.ne.s32.totalorder %s6915_s0, %s6270_s23  ;;  %p6274_p9 = scmp.lt.u32.totalorder %s6270_s23, %s6915_s0 }
  0x18   :  { %p6276_p10 = pnand %p6274_p9, %p6271_p8 }
  0x1a   :  { %6279 = shalt.err (!%p6276_p10)
}
  0x1b   :  { %s6280_s29 = scalar_lea.vmem %s6431_s30, 256  ;;  %p6285_p12 = scmp.lt.s32.totalorder %s6431_s30, %s6431_s30 }
  0x1c   :  { %p6281_p11 = scmp.ne.s32.totalorder %s6431_s30, %s6280_s29  ;;  %p6286_p13 = scmp.lt.s32.totalorder %s6280_s29, %s6280_s29 }
  0x1e   :  { %p6287_p0 = por %p6286_p13, %p6285_p12 }
  0x20   :  { %p6288_p1 = pnand %p6287_p0, %p6281_p11 }
  0x22   :  { %6291 = shalt.err (!%p6288_p1)
}
  0x23   :  { %28 = dma.hbm_to_vmem [thread:$0]  %s6915_s0, 256, %s6431_s30, [#allocation3], %s6368_s17, %s6368_s17, %s6369_s18  }
  0x24   :  { %s6370_s9 = smov [#allocation7]   ;;  %s6371_s11 = smov [#allocation8]  }
  0x25   :  { %s46_s10 = sshll.u32 %s6370_s9, 4  ;;  %s64_s12 = sshll.u32 %s6371_s11, 4  ;;  %s47_s10 = int_to_ptr.vmem [resolvable:$true] %s46_s10  ;;  %s6468_s12 = int_to_ptr.vmem [resolvable:$true] %s64_s12 }
  0x26   :  { %s6292_s15 = scalar_lea.hbm %s6917_s2, 256 }
  0x27   :  { %p6293_p2 = scmp.ne.s32.totalorder %s6917_s2, %s6292_s15  ;;  %p6296_p3 = scmp.lt.u32.totalorder %s6292_s15, %s6917_s2 }
  0x29   :  { %p6298_p4 = pnand %p6296_p3, %p6293_p2 }
  0x2b   :  { %6301 = shalt.err (!%p6298_p4)
}
  0x2c   :  { %s6302_s0 = scalar_lea.vmem %s47_s10, 256  ;;  %p6307_p6 = scmp.lt.s32.totalorder %s47_s10, %s47_s10 }
  0x2d   :  { %p6303_p5 = scmp.ne.s32.totalorder %s47_s10, %s6302_s0  ;;  %p6308_p7 = scmp.lt.s32.totalorder %s6302_s0, %s6302_s0 }
  0x2f   :  { %p6309_p8 = por %p6308_p7, %p6307_p6 }
  0x31   :  { %p6310_p9 = pnand %p6309_p8, %p6303_p5 }
  0x33   :  { %6313 = shalt.err (!%p6310_p9)
}
  0x34   :  { %52 = dma.hbm_to_vmem [thread:$0]  %s6917_s2, 256, %s47_s10, [#allocation6], %s6368_s17, %s6368_s17, %s6369_s18  }
  0x35   :  { %s6314_s25 = scalar_lea.hbm %s6921_s6, 512 }
  0x36   :  { %p6315_p10 = scmp.ne.s32.totalorder %s6921_s6, %s6314_s25  ;;  %p6318_p11 = scmp.lt.u32.totalorder %s6314_s25, %s6921_s6 }
  0x38   :  { %p6320_p12 = pnand %p6318_p11, %p6315_p10 }
  0x3a   :  { %6323 = shalt.err (!%p6320_p12)
}
  0x3b   :  { %s6324_s28 = scalar_lea.vmem %s6468_s12, 512  ;;  %p6329_p0 = scmp.lt.s32.totalorder %s6468_s12, %s6468_s12 }
  0x3c   :  { %p6325_p13 = scmp.ne.s32.totalorder %s6468_s12, %s6324_s28  ;;  %p6330_p1 = scmp.lt.s32.totalorder %s6324_s28, %s6324_s28 }
  0x3e   :  { %p6331_p2 = por %p6330_p1, %p6329_p0 }
  0x40   :  { %p6332_p3 = pnand %p6331_p2, %p6325_p13 }
  0x42   :  { %6335 = shalt.err (!%p6332_p3)
}
  0x43   :  { %70 = dma.hbm_to_vmem [thread:$0]  %s6921_s6, 512, %s6468_s12, [#allocation9], %s6368_s17, %s6368_s17, %s6369_s18  }
  0x44   :  { %6358 = dma.done.wait [#allocation3], 256  }
  0x45   :  { %6359 = vsyncadd [#allocation3], 4294967040 }
  0x46   :  { %6360 = dma.done.wait [#allocation6], 512  }
  0x47   :  { %6361 = vsyncadd [#allocation6], 4294966784 }
  0x48   :  { %6362 = dma.done.wait [#allocation9], 512  }
  0x49   :  { %6363 = vsyncadd [#allocation9], 4294966784  ;;  %vm93_vm0 = vcmask 261120   ;;  %v89_v0 = vld [vmem:[%s6918_s3] sm:$0xff]  ;;  %v90_v1 = vld [vmem:[%s6918_s3 + $0x8] sm:$0xff]  ;;  %vm6373_vm1 = vmmov 0  }
  0x4a   :  { %v91_v2 = vld [vmem:[%s6918_s3 + $0x10] sm:$0xff]  ;;  %v101_v3 = vand.u32 4294901760, %v89_v0  ;;  %v104_v4 = vand.u32 4294901760, %v90_v1  ;;  %v92_v5 = vld [vmem:[%s6918_s3 + $0x18] sm:$0xff]  ;;  %v85_v7 = vld [vmem:[#allocation2] sm:$0xff]  ;;  %vm2197_vm4 = vcmask 130048  }
  0x4b   :  { %v107_v6 = vand.u32 4294901760, %v91_v2  ;;  %v86_v8 = vld [vmem:[#allocation2 + $0x8] sm:$0xff]  ;;  %v110_v9 = vand.u32 4294901760, %v92_v5  ;;  %v95_v10 = vsel %vm93_vm0, %v85_v7, 0  ;;  %v87_v20 = vld [vmem:[#allocation5] sm:$0xff]  ;;  %v88_v47 = vld [vmem:[#allocation5 + $0x8] sm:$0xff] }
  0x4c   :  { %v98_v11 = vsel %vm93_vm0, %v86_v8, 0  ;;  %v6519_v12 = vpack.c.bf16 %v104_v4, %v101_v3  ;;  %v6521_v13 = vand.u32 4294901760, %v95_v10  ;;  %v191_v15 = vsub.f32 %v89_v0, %v101_v3  ;;  %v1162_v60 = vld [vmem:[%s6919_s4] sm:$0xff]  ;;  %v1163_v61 = vld [vmem:[%s6919_s4 + $0x8] sm:$0xff]  ;;  %v1164_v3 = vld [vmem:[%s6919_s4 + $0x10] sm:$0xff]  ;;  %s6381_s25 = smov 112  }
  0x4d   :  { %v6523_v14 = vand.u32 4294901760, %v98_v11  ;;  %v6525_v16 = vpack.c.bf16 %v110_v9, %v107_v6  ;;  %v198_v17 = vsub.f32 %v90_v1, %v104_v4  ;;  %v205_v18 = vsub.f32 %v91_v2, %v107_v6  ;;  %v1165_v4 = vld [vmem:[%s6919_s4 + $0x18] sm:$0xff]  ;;  %s6382_s26 = smov 104   ;;  %s6383_s27 = smov 16  }
  0x4e   :  { %v212_v19 = vsub.f32 %v92_v5, %v110_v9  ;;  %5776 = vmatprep.subr.bf16.mxu1 %v6519_v12  ;;  %5800 = vmatprep.subr.bf16.mxu0 %v6519_v12  ;;  %v170_v21 = vsub.f32 %v95_v10, %v6521_v13  ;;  %v192_v23 = vand.u32 4294901760, %v191_v15  ;;  %v629_v30 = vsel %vm93_vm0, %v87_v20, 0  ;;  %s6384_s29 = smov 24   ;;  %s6385_s2 = smov [#allocation10]  }
  0x4f   :  { %v6531_v22 = vsub.f32 %v98_v11, %v6523_v14  ;;  %5778 = vmatpush3.bf16.msra.mxu1 %v6519_v12  ;;  %5802 = vmatpush3.bf16.msra.mxu0 %v6519_v12  ;;  %v199_v24 = vand.u32 4294901760, %v198_v17  ;;  %v206_v25 = vand.u32 4294901760, %v205_v18  ;;  %v6545_v43 = vand.u32 4294901760, %v629_v30  ;;  %s5020_s9 = sshll.u32 %s6385_s2, 4  ;;  %s5021_s9 = int_to_ptr.vmem [resolvable:$true] %s5020_s9 }
  0x50   :  { %v213_v26 = vand.u32 4294901760, %v212_v19  ;;  %5780 = vmatprep.subr.bf16.mxu1 %v6525_v16  ;;  %5804 = vmatprep.subr.bf16.mxu0 %v6525_v16  ;;  %v171_v27 = vand.u32 4294901760, %v170_v21  ;;  %v193_v29 = vsub.f32 %v191_v15, %v192_v23  ;;  %v632_v49 = vsel %vm93_vm0, %v88_v47, 0  ;;  %s6336_s10 = scalar_lea.vmem %s5021_s9, 256  ;;  %p6341_p5 = scmp.lt.s32.totalorder %s5021_s9, %s5021_s9 }
  0x51   :  { %v181_v28 = vand.u32 4294901760, %v6531_v22  ;;  %v200_v31 = vsub.f32 %v198_v17, %v199_v24  ;;  %v6539_v32 = vpack.c.bf16 %v199_v24, %v192_v23  ;;  %v207_v33 = vsub.f32 %v205_v18, %v206_v25  ;;  %p6337_p4 = scmp.ne.s32.totalorder %s5021_s9, %s6336_s10  ;;  %p6342_p6 = scmp.lt.s32.totalorder %s6336_s10, %s6336_s10 }
  0x52   :  { %v214_v34 = vsub.f32 %v212_v19, %v213_v26  ;;  %v172_v35 = vsub.f32 %v170_v21, %v171_v27  ;;  %5342 = vmatprep.mubr.f32.mxu0 %v171_v27  ;;  %v194_v37 = vand.u32 4294901760, %v193_v29  ;;  %v6547_v46 = vpack.c.bf16 %v213_v26, %v206_v25 }
  0x53   :  { %v182_v36 = vsub.f32 %v6531_v22, %v181_v28  ;;  %5782 = vmatpush3.bf16.msra.mxu1 %v6525_v16  ;;  %5806 = vmatpush3.bf16.msra.mxu0 %v6525_v16  ;;  %v201_v38 = vand.u32 4294901760, %v200_v31  ;;  %v208_v39 = vand.u32 4294901760, %v207_v33  ;;  %v704_v48 = vsub.f32 %v629_v30, %v6545_v43  ;;  %p6343_p7 = por %p6342_p6, %p6341_p5 }
  0x54   :  { %v215_v40 = vand.u32 4294901760, %v214_v34  ;;  %v173_v41 = vand.u32 4294901760, %v172_v35  ;;  %5808 = vmatprep.subr.bf16.mxu0 %v6539_v32  ;;  %v5791_v50 = vpack.c.bf16 %v198_v17, %v191_v15  ;;  %v713_v51 = vand.u32 4294901760, %v632_v49 }
  0x55   :  { %v183_v42 = vand.u32 4294901760, %v182_v36  ;;  %v5783_v44 = vpack.c.bf16 %v201_v38, %v194_v37  ;;  %v705_v52 = vand.u32 4294901760, %v704_v48  ;;  %v5795_v53 = vpack.c.bf16 %v212_v19, %v205_v18  ;;  %p6344_p8 = pnand %p6343_p7, %p6337_p4 }
  0x56   :  { %v5787_v45 = vpack.c.bf16 %v215_v40, %v208_v39  ;;  %5309 = vmatprep.mubr.f32.mxu1 %v173_v41  ;;  %5343 = vmatmul.mubr.f32.vlgmr.msra.gmra.mrb[0].mxu0 %v181_v28  ;;  %v714_v54 = vsub.f32 %v632_v49, %v713_v51  ;;  %v1173_v62 = vand.u32 4294901760, %v1162_v60  ;;  %v1176_v63 = vand.u32 4294901760, %v1163_v61 }
  0x57   :  { %5310 = vmatmul.mubr.f32.vlgmr.msra.gmra.mrb[0].mxu1 %v183_v42  ;;  %5784 = vmatprep.subr.bf16.mxu1 %v5783_v44  ;;  %v706_v55 = vsub.f32 %v704_v48, %v705_v52  ;;  %v1179_v5 = vand.u32 4294901760, %v1164_v3  ;;  %v1182_v6 = vand.u32 4294901760, %v1165_v4  ;;  %v6372_v28 = vmov 0.0|0.0  }
  0x58   :  { %5786 = vmatpush3.bf16.msra.mxu1 %v5783_v44  ;;  %5810 = vmatpush3.bf16.msra.mxu0 %v6539_v32  ;;  %v715_v56 = vand.u32 4294901760, %v714_v54  ;;  %v6590_v0 = vpack.c.bf16 %v1176_v63, %v1173_v62  ;;  %v1263_v1 = vsub.f32 %v1162_v60, %v1173_v62  ;;  %v1270_v2 = vsub.f32 %v1163_v61, %v1176_v63 }
  0x59   :  { %5788 = vmatprep.subr.bf16.mxu1 %v5787_v45  ;;  %5812 = vmatprep.subr.bf16.mxu0 %v6547_v46  ;;  %v707_v57 = vand.u32 4294901760, %v706_v55  ;;  %v6600_v9 = vpack.c.bf16 %v1182_v6, %v1179_v5  ;;  %v6374_v29 = vmov 0.0   ;;  %vm4460_vm11 = vcmask 64512  }
  0x5a   :  { %5320 = vmatprep.mubr.f32.mxu1 %v6521_v13  ;;  %5353 = vmatprep.mubr.f32.mxu0 %v6521_v13  ;;  %v716_v58 = vsub.f32 %v714_v54, %v715_v56  ;;  %v1264_v7 = vand.u32 4294901760, %v1263_v1  ;;  %v1271_v8 = vand.u32 4294901760, %v1270_v2  ;;  %v5887_v24 = vpack.c.bf16 %v1270_v2, %v1263_v1 }
  0x5b   :  { %vm4465_vm14 = vcmask 195584  }
  0x5c   :  { %5790 = vmatpush3.bf16.msra.mxu1 %v5787_v45  ;;  %5814 = vmatpush3.bf16.msra.mxu0 %v6547_v46  ;;  %v717_v59 = vand.u32 4294901760, %v716_v58  ;;  %v1265_v10 = vsub.f32 %v1263_v1, %v1264_v7  ;;  %v1272_v11 = vsub.f32 %v1270_v2, %v1271_v8  ;;  %v5903_v26 = vpack.c.bf16 %v1271_v8, %v1264_v7 }
  0x5d   :  { %5792 = vmatprep.subr.bf16.mxu1 %v5791_v50  ;;  %5816 = vmatprep.subr.bf16.mxu0 %v6519_v12 }
  0x5e   :  { %v1273_v15 = vand.u32 4294901760, %v1272_v11 }
  0x5f   :  { %5321 = vmatmul.mubr.f32.vlgmr.msra.gmra.mrb[0].mxu1 %v6523_v14  ;;  %5354 = vmatmul.mubr.f32.vlgmr.msra.gmra.mrb[0].mxu0 %v6523_v14 }
  0x60   :  { %5794 = vmatpush3.bf16.msra.mxu1 %v5791_v50  ;;  %5818 = vmatpush3.bf16.msra.mxu0 %v6519_v12 }
  0x61   :  { %5796 = vmatprep.subr.bf16.mxu1 %v5795_v53  ;;  %5820 = vmatprep.subr.bf16.mxu0 %v6525_v16 }
  0x62   :  { %5331 = vmatprep.mubr.f32.mxu1 %v170_v21  ;;  %5364 = vmatprep.mubr.f32.mxu0 %v6521_v13  ;;  %v1284_v13 = vsub.f32 %v1165_v4, %v1182_v6 }
  0x64   :  { %5798 = vmatpush3.bf16.msra.mxu1 %v5795_v53  ;;  %5822 = vmatpush3.bf16.msra.mxu0 %v6525_v16  ;;  %v1285_v17 = vand.u32 4294901760, %v1284_v13 }
  0x65   :  { %5824 = vmatprep.subr.bf16.mxu1 %v6519_v12  ;;  %5872 = vmatprep.subr.bf16.mxu0 %v6590_v0 }
  0x66   :  { %v1286_v20 = vsub.f32 %v1284_v13, %v1285_v17 }
  0x67   :  { %5332 = vmatmul.mubr.f32.vlgmr.msra.gmra.mrb[0].mxu1 %v6531_v22  ;;  %5365 = vmatmul.mubr.f32.vlgmr.msra.gmra.mrb[0].mxu0 %v6523_v14  ;;  %v1266_v14 = vand.u32 4294901760, %v1265_v10 }
  0x68   :  { %5826 = vmatpush3.bf16.msra.mxu1 %v6519_v12  ;;  %5375 = vmatprep.mubr.f32.mxu1 %v707_v57  ;;  %v1287_v22 = vand.u32 4294901760, %v1286_v20 }
  0x69   :  { %5828 = vmatprep.subr.bf16.mxu1 %v6525_v16  ;;  %5874 = vmatpush3.bf16.msra.mxu0 %v6590_v0  ;;  %v5879_v18 = vpack.c.bf16 %v1273_v15, %v1266_v14 }
  0x6a   :  { %5876 = vmatprep.subr.bf16.mxu0 %v6600_v9 }
  0x6c   :  { %5830 = vmatpush3.bf16.msra.mxu1 %v6525_v16 }
  0x6d   :  { %5832 = vmatprep.subr.bf16.mxu1 %v5783_v44  ;;  %5878 = vmatpush3.bf16.msra.mxu0 %v6600_v9 }
  0x6e   :  { %5880 = vmatprep.subr.bf16.mxu0 %v5879_v18 }
  0x6f   :  { %5376 = vmatmul.mubr.f32.vlgmr.msra.gmra.mrb[2].mxu1 %v717_v59 }
  0x70   :  { %5834 = vmatpush3.bf16.msra.mxu1 %v5783_v44  ;;  %5386 = vmatprep.mubr.f32.mxu1 %v6545_v43 }
  0x71   :  { %5836 = vmatprep.subr.bf16.mxu1 %v5787_v45 }
  0x74   :  { %5838 = vmatpush3.bf16.msra.mxu1 %v5787_v45 }
  0x75   :  { %5840 = vmatprep.subr.bf16.mxu1 %v5791_v50 }
  0x77   :  { %5387 = vmatmul.mubr.f32.vlgmr.msra.gmra.mrb[2].mxu1 %v713_v51 }
  0x78   :  { %5842 = vmatpush3.bf16.msra.mxu1 %v5791_v50  ;;  %5397 = vmatprep.mubr.f32.mxu1 %v704_v48  ;;  %v1700_v48 = vld [vmem:[%s6920_s5] sm:$0xf]  ;;  %s6380_s5 = smov 120  }
  0x79   :  { %5844 = vmatprep.subr.bf16.mxu1 %v5795_v53  ;;  %v1702_v49 = vsel %vm93_vm0, %v1700_v48, 0 }
  0x7a   :  { %v6621_v50 = vand.u32 4294901760, %v1702_v49 }
  0x7c   :  { %5846 = vmatpush3.bf16.msra.mxu1 %v5795_v53 }
  0x7d   :  { %5848 = vmatprep.subr.bf16.mxu1 %v6519_v12 }
  0x7f   :  { %5398 = vmatmul.mubr.f32.vlgmr.msra.gmra.mrb[2].mxu1 %v714_v54 }
  0x80   :  { %5850 = vmatpush3.bf16.msra.mxu1 %v6519_v12  ;;  %5408 = vmatprep.mubr.f32.mxu1 %v705_v52 }
  0x81   :  { %5852 = vmatprep.subr.bf16.mxu1 %v6525_v16 }
  0x84   :  { %5854 = vmatpush3.bf16.msra.mxu1 %v6525_v16 }
  0x85   :  { %5856 = vmatprep.subr.bf16.mxu1 %v6539_v32 }
  0x87   :  { %5409 = vmatmul.mubr.f32.vlgmr.msra.gmra.mrb[2].mxu1 %v715_v56 }
  0x88   :  { %5858 = vmatpush3.bf16.msra.mxu1 %v6539_v32  ;;  %5419 = vmatprep.mubr.f32.mxu1 %v6545_v43 }
  0x89   :  { %5860 = vmatprep.subr.bf16.mxu1 %v6547_v46 }
  0x8c   :  { %5862 = vmatpush3.bf16.msra.mxu1 %v6547_v46 }
  0x8d   :  { %5864 = vmatprep.subr.bf16.mxu1 %v6519_v12 }
  0x8f   :  { %5420 = vmatmul.mubr.f32.vlgmr.msra.gmra.mrb[2].mxu1 %v713_v51 }
  0x90   :  { %5866 = vmatpush3.bf16.msra.mxu1 %v6519_v12  ;;  %5430 = vmatprep.mubr.f32.mxu1 %v6545_v43  ;;  %v1277_v12 = vsub.f32 %v1164_v3, %v1179_v5 }
  0x91   :  { %5868 = vmatprep.subr.bf16.mxu1 %v6525_v16 }
  0x92   :  { %v5891_v25 = vpack.c.bf16 %v1284_v13, %v1277_v12 }
  0x94   :  { %5870 = vmatpush3.bf16.msra.mxu1 %v6525_v16  ;;  %v1278_v16 = vand.u32 4294901760, %v1277_v12 }
  0x95   :  { %5919 = vmatprep.subr.bf16.mxu1 %v6372_v28 }
  0x96   :  { %v1279_v19 = vsub.f32 %v1277_v12, %v1278_v16  ;;  %v5907_v27 = vpack.c.bf16 %v1285_v17, %v1278_v16 }
  0x97   :  { %5431 = vmatmul.mubr.f32.vlgmr.msra.gmra.mrb[2].mxu1 %v713_v51  ;;  %v1778_v51 = vsub.f32 %v1702_v49, %v6621_v50  ;;  %v6379_v49 = vmov -9e+15  }
  0x98   :  { %v1280_v21 = vand.u32 4294901760, %v1279_v19  ;;  %5503 = vmatprep.mubr.msk.f32.mxu1 %vm6373_vm1, %v6374_v29 }
  0x99   :  { %v1779_v59 = vand.u32 4294901760, %v1778_v51 }
  0x9a   :  { %v5883_v23 = vpack.c.bf16 %v1287_v22, %v1280_v21 }
  0x9b   :  { %v1780_v4 = vsub.f32 %v1778_v51, %v1779_v59 }
  0x9d   :  { %v1781_v17 = vand.u32 4294901760, %v1780_v4 }
 0x13a   :  { %v5333_v30 = vpop.f32.mrb[0].mxu1  ;;  %v5366_v31 = vpop.f32.mrb[0].mxu0 }
 0x13b   :  { %v6081_v32 = vadd.f32 %v5366_v31, %v5333_v30  ;;  %v362_v33 = vpop.f32.mrb[1].mxu1  ;;  %v618_v34 = vpop.f32.mrb[1].mxu0  ;;  %v2185_v31 = vlaneseq }
 0x13c   :  { %v6082_v35 = vadd.f32 %v618_v34, %v362_v33 }
 0x13d   :  { %v1170_v36 = vsel %vm93_vm0, %v6081_v32, 0  ;;  %v2186_v32 = vshrl.u32 %v2185_v31, 7 }
 0x13e   :  { %v6608_v37 = vand.u32 4294901760, %v1170_v36  ;;  %v1167_v38 = vsel %vm93_vm0, %v6082_v35, 0  ;;  %v2169_v35 = vld [vmem:[#allocation7] sm:$0xff] }
 0x13f   :  { %v1241_v39 = vand.u32 4294901760, %v1167_v38  ;;  %v2748_v33 = vsub.s32 1, %v2186_v32  ;;  %v2187_v34 = vsub.s32 0, %v2186_v32  ;;  %vm2171_vm2 = vcmp.gt.f32.partialorder %v2169_v35, 0.0 }
 0x140   :  { %v1252_v40 = vsub.f32 %v1170_v36, %v6608_v37  ;;  %v3880_v48 = vsub.s32 3, %v2186_v32 }
 0x141   :  { %v1242_v41 = vsub.f32 %v1167_v38, %v1241_v39 }
 0x142   :  { %v1253_v42 = vand.u32 4294901760, %v1252_v40 }
 0x143   :  { %v1243_v43 = vand.u32 4294901760, %v1242_v41 }
 0x144   :  { %v1254_v44 = vsub.f32 %v1252_v40, %v1253_v42 }
 0x145   :  { %v1244_v45 = vsub.f32 %v1242_v41, %v1243_v43 }
 0x146   :  { %v1255_v47 = vand.u32 4294901760, %v1254_v44 }
 0x147   :  { %v1245_v46 = vand.u32 4294901760, %v1244_v45 }
 0x149   :  { %5441 = vmatprep.mubr.f32.mxu0 %v1245_v46 }
 0x14a   :  { %5442 = vmatmul.mubr.f32.vlgmr.msra.gmra.mrb[2].mxu0 %v1255_v47  ;;  %v3314_v47 = vsub.s32 2, %v2186_v32 }
 0x14b   :  { %5882 = vmatpush3.bf16.msra.mxu0 %v5879_v18  ;;  %5452 = vmatprep.mubr.f32.mxu0 %v1241_v39 }
 0x14c   :  { %5884 = vmatprep.subr.bf16.mxu0 %v5883_v23 }
 0x14f   :  { %5886 = vmatpush3.bf16.msra.mxu0 %v5883_v23  ;;  %v6375_v23 = vmov 1  }
 0x150   :  { %5888 = vmatprep.subr.bf16.mxu0 %v5887_v24  ;;  %6194 = vset.pattern.permute.xlu1 %v6375_v23 }
 0x152   :  { %5453 = vmatmul.mubr.f32.vlgmr.msra.gmra.mrb[2].mxu0 %v6608_v37 }
 0x153   :  { %5890 = vmatpush3.bf16.msra.mxu0 %v5887_v24  ;;  %5463 = vmatprep.mubr.f32.mxu0 %v1242_v41  ;;  %v6376_v24 = vmov 0  }
 0x154   :  { %5892 = vmatprep.subr.bf16.mxu0 %v5891_v25  ;;  %6193 = vset.pattern.permute.xlu0 %v6376_v24 }
 0x157   :  { %5894 = vmatpush3.bf16.msra.mxu0 %v5891_v25 }
 0x158   :  { %5896 = vmatprep.subr.bf16.mxu0 %v6590_v0 }
 0x15a   :  { %5464 = vmatmul.mubr.f32.vlgmr.msra.gmra.mrb[2].mxu0 %v1252_v40 }
 0x15b   :  { %5898 = vmatpush3.bf16.msra.mxu0 %v6590_v0  ;;  %5474 = vmatprep.mubr.f32.mxu0 %v1243_v43 }
 0x15c   :  { %5900 = vmatprep.subr.bf16.mxu0 %v6600_v9 }
 0x15f   :  { %5902 = vmatpush3.bf16.msra.mxu0 %v6600_v9 }
 0x160   :  { %5904 = vmatprep.subr.bf16.mxu0 %v5903_v26 }
 0x162   :  { %5475 = vmatmul.mubr.f32.vlgmr.msra.gmra.mrb[2].mxu0 %v1253_v42  ;;  %v2170_v42 = vld [vmem:[#allocation7 + $0x8] sm:$0xff] }
 0x163   :  { %5906 = vmatpush3.bf16.msra.mxu0 %v5903_v26  ;;  %5485 = vmatprep.mubr.f32.mxu0 %v1241_v39  ;;  %vm2172_vm3 = vcmp.gt.f32.partialorder %v2170_v42, 0.0 }
 0x164   :  { %5908 = vmatprep.subr.bf16.mxu0 %v5907_v27 }
 0x167   :  { %5910 = vmatpush3.bf16.msra.mxu0 %v5907_v27  ;;  %v6377_v27 = vmov 2  }
 0x168   :  { %5912 = vmatprep.subr.bf16.mxu0 %v6590_v0 }
 0x16a   :  { %5486 = vmatmul.mubr.f32.vlgmr.msra.gmra.mrb[2].mxu0 %v6608_v37  ;;  %v6626_v52 = vpop.f32.mrb[2].mxu1 }
 0x16b   :  { %5914 = vmatpush3.bf16.msra.mxu0 %v6590_v0  ;;  %5496 = vmatprep.mubr.f32.mxu0 %v1241_v39  ;;  %v2230_v53 = vand.u32 4294901760, %v6626_v52  ;;  %v6630_v54 = vpop.f32.mrb[3].mxu1  ;;  %v1708_v55 = vsel %vm93_vm0, %v6626_v52, 0 }
 0x16c   :  { %v2227_v56 = vand.u32 4294901760, %v6630_v54  ;;  %5916 = vmatprep.subr.bf16.mxu0 %v6600_v9  ;;  %v1705_v57 = vsel %vm93_vm0, %v6630_v54, 0  ;;  %v1714_v58 = vand.u32 4294901760, %v1708_v55 }
 0x16d   :  { %v1711_v60 = vand.u32 4294901760, %v1705_v57  ;;  %v2322_v61 = vsub.f32 %v6626_v52, %v2230_v53 }
 0x16e   :  { %v6639_v62 = vpack.c.bf16 %v2230_v53, %v2227_v56  ;;  %v1796_v63 = vsub.f32 %v1708_v55, %v1714_v58  ;;  %v2315_v0 = vsub.f32 %v6630_v54, %v2227_v56 }
 0x16f   :  { %5918 = vmatpush3.bf16.msra.mxu0 %v6600_v9  ;;  %v5920_v1 = vpack.c.bf16 %v1714_v58, %v1711_v60  ;;  %v1789_v2 = vsub.f32 %v1705_v57, %v1711_v60  ;;  %v2323_v3 = vand.u32 4294901760, %v2322_v61 }
 0x170   :  { %v1797_v5 = vand.u32 4294901760, %v1796_v63  ;;  %5938 = vmatprep.subr.bf16.mxu0 %v6639_v62  ;;  %v2316_v6 = vand.u32 4294901760, %v2315_v0  ;;  %v6644_v7 = vpack.c.bf16 %v2322_v61, %v2315_v0 }
 0x171   :  { %5921 = vmatpush3.bf16.xpose.msra.mxu1 %v5920_v1  ;;  %v1790_v8 = vand.u32 4294901760, %v1789_v2  ;;  %v5926_v10 = vpack.c.bf16 %v1796_v63, %v1789_v2  ;;  %v2324_v11 = vsub.f32 %v2322_v61, %v2323_v3 }
 0x172   :  { %5497 = vmatmul.mubr.f32.vlgmr.msra.gmra.mrb[2].mxu0 %v6608_v37  ;;  %5922 = vmatprep.subr.bf16.mxu1 %v6372_v28  ;;  %v1798_v12 = vsub.f32 %v1796_v63, %v1797_v5  ;;  %v2317_v9 = vsub.f32 %v2315_v0, %v2316_v6  ;;  %v6648_v13 = vpack.c.bf16 %v2323_v3, %v2316_v6  ;;  %v2174_v63 = vsel %vm2172_vm3, 0.0, %v6379_v49 }
 0x173   :  { %v1791_v14 = vsub.f32 %v1789_v2, %v1790_v8  ;;  %v5932_v15 = vpack.c.bf16 %v1797_v5, %v1790_v8  ;;  %5940 = vmatpush3.bf16.msra.mxu0 %v6639_v62  ;;  %v2325_v16 = vand.u32 4294901760, %v2324_v11 }
 0x174   :  { %v1799_v18 = vand.u32 4294901760, %v1798_v12  ;;  %v2318_v19 = vand.u32 4294901760, %v2317_v9 }
 0x175   :  { %v1792_v20 = vand.u32 4294901760, %v1791_v14 }
 0x176   :  { %v6651_v21 = vpack.c.bf16 %v2325_v16, %v2318_v19 }
 0x177   :  { %v5923_v22 = vpack.c.bf16 %v1799_v18, %v1792_v20 }
 0x178   :  { %5504 = vmatmul.mubr.f32.vlgmr.msra.gmra.mrb[4].mxu1 %v1781_v17  ;;  %5942 = vmatprep.subr.bf16.mxu0 %v6651_v21 }
 0x179   :  { %5924 = vmatpush3.bf16.xpose.msra.mxu1 %v5923_v22  ;;  %5510 = vmatprep.mubr.msk.f32.mxu1 %vm6373_vm1, %v6374_v29 }
 0x17a   :  { %5925 = vmatprep.subr.bf16.mxu1 %v6372_v28 }
 0x180   :  { %5511 = vmatmul.mubr.f32.vlgmr.msra.gmra.mrb[4].mxu1 %v6621_v50 }
 0x181   :  { %5927 = vmatpush3.bf16.xpose.msra.mxu1 %v5926_v10  ;;  %5517 = vmatprep.mubr.msk.f32.mxu1 %vm6373_vm1, %v6374_v29 }
 0x182   :  { %5928 = vmatprep.subr.bf16.mxu1 %v6372_v28 }
 0x188   :  { %5518 = vmatmul.mubr.f32.vlgmr.msra.gmra.mrb[4].mxu1 %v1778_v51 }
 0x189   :  { %5930 = vmatpush3.bf16.xpose.msra.mxu1 %v5920_v1  ;;  %5524 = vmatprep.mubr.msk.f32.mxu1 %vm6373_vm1, %v6374_v29 }
 0x18a   :  { %5931 = vmatprep.subr.bf16.mxu1 %v6372_v28 }
 0x190   :  { %5525 = vmatmul.mubr.f32.vlgmr.msra.gmra.mrb[4].mxu1 %v1779_v59 }
 0x191   :  { %5933 = vmatpush3.bf16.xpose.msra.mxu1 %v5932_v15  ;;  %5531 = vmatprep.mubr.msk.f32.mxu1 %vm6373_vm1, %v6374_v29 }
 0x192   :  { %5934 = vmatprep.subr.bf16.mxu1 %v6372_v28  ;;  %v6378_v28 = vmov 3  }
 0x198   :  { %5532 = vmatmul.mubr.f32.vlgmr.msra.gmra.mrb[4].mxu1 %v6621_v50 }
 0x199   :  { %5936 = vmatpush3.bf16.xpose.msra.mxu1 %v5920_v1  ;;  %5538 = vmatprep.mubr.msk.f32.mxu1 %vm6373_vm1, %v6374_v29 }
 0x1a0   :  { %5539 = vmatmul.mubr.f32.vlgmr.msra.gmra.mrb[4].mxu1 %v6621_v50  ;;  %v2173_v50 = vsel %vm2171_vm2, 0.0, %v6379_v49 }
 0x245   :  { %v5498_v25 = vpop.f32.mrb[2].mxu0 }
 0x246   :  { %v1690_v26 = vpop.f32.mrb[3].mxu0 }
 0x247   :  { %2739 = vperm.xlu1 %6194, %v1690_v26   ;;  %2177 = vperm.xlu0 %6193, %v1690_v26  }
 0x24b   :  { %2743 = vperm.xlu1 %6194, %v5498_v25   ;;  %2182 = vperm.xlu0 %6193, %v5498_v25  }
 0x24f   :  { %6195 = vset.pattern.permute.xlu1 %v6377_v27  ;;  %6196 = vset.pattern.permute.xlu0 %v6378_v28 }
 0x250   :  { %3309 = vperm.xlu1 %6195, %v5498_v25   ;;  %3875 = vperm.xlu0 %6196, %v5498_v25  }
 0x254   :  { %6198 = vset.pattern.permute.xlu1 %v6378_v28  ;;  %6197 = vset.pattern.permute.xlu0 %v6377_v27 }
 0x255   :  { %3871 = vperm.xlu1 %6198, %v1690_v26   ;;  %3305 = vperm.xlu0 %6197, %v1690_v26  }
 0x259   :  { %6199 = vset.pattern.permute.xlu0 %v6378_v28 }
 0x273   :  { %v2165_v29 = vpop.f32.mrb[4].mxu1 }
 0x274   :  { %v5540_v30 = vpop.f32.mrb[5].mxu1  ;;  %v2749_v36 = vrot.slane %v2165_v29, %v2748_v33  ;;  %v2188_v37 = vrot.slane %v2165_v29, %v2187_v34  ;;  %v3315_v60 = vrot.slane %v2165_v29, %v3314_v47  ;;  %v3881_v61 = vrot.slane %v2165_v29, %v3880_v48 }
 0x2c6   :  { %v2740_v38 = vpop.permute.xlu1 %2739  ;;  %v2178_v39 = vpop.permute.xlu0 %2177 }
 0x2c7   :  { %v2750_v40 = vadd.f32 %v2749_v36, %v2740_v38  ;;  %v2189_v41 = vadd.f32 %v2188_v37, %v2178_v39 }
 0x2c9   :  { %v2752_v43 = vmul.f32 0.2, %v2750_v40  ;;  %v2191_v44 = vmul.f32 0.2, %v2189_v41 }
 0x2ca   :  { %v2744_v45 = vpop.permute.xlu1 %2743  ;;  %v2183_v46 = vpop.permute.xlu0 %2182 }
 0x2cb   :  { %v2754_v51 = vmax.f32 %v2750_v40, %v2752_v43  ;;  %v2193_v53 = vmax.f32 %v2189_v41, %v2191_v44  ;;  %v2751_v55 = vadd.f32 %v2749_v36, %v2744_v45  ;;  %v2190_v56 = vadd.f32 %v2188_v37, %v2183_v46 }
 0x2cd   :  { %v2753_v57 = vmul.f32 0.2, %v2751_v55  ;;  %v2192_v58 = vmul.f32 0.2, %v2190_v56  ;;  %v2195_v59 = vadd.f32 %v2193_v53, %v2173_v50  ;;  %v2756_v5 = vadd.f32 %v2754_v51, %v2173_v50 }
 0x2cf   :  { %v2755_v0 = vmax.f32 %v2751_v55, %v2753_v57  ;;  %v2194_v1 = vmax.f32 %v2190_v56, %v2192_v58  ;;  %v3310_v2 = vpop.permute.xlu1 %3309  ;;  %v3876_v3 = vpop.permute.xlu0 %3875  ;;  %v2198_v4 = vsel %vm2197_vm4, %v2195_v59, -inf  ;;  %v2758_v9 = vsel %vm2197_vm4, %v2756_v5, -inf }
 0x2d0   :  { %v3317_v6 = vadd.f32 %v3315_v60, %v3310_v2  ;;  %v3883_v8 = vadd.f32 %v3881_v61, %v3876_v3  ;;  %2199 = vmax.xlane.f32.xlu1 %v2198_v4 }
 0x2d1   :  { %v2196_v10 = vadd.f32 %v2194_v1, %v2174_v63  ;;  %v2757_v15 = vadd.f32 %v2755_v0, %v2174_v63 }
 0x2d2   :  { %v3319_v11 = vmul.f32 0.2, %v3317_v6  ;;  %v3885_v12 = vmul.f32 0.2, %v3883_v8 }
 0x2d3   :  { %v2201_v14 = vsel %vm2197_vm4, %v2196_v10, -inf  ;;  %v2761_v18 = vsel %vm2197_vm4, %v2757_v15, -inf }
 0x2d4   :  { %v3321_v16 = vmax.f32 %v3317_v6, %v3319_v11  ;;  %2759 = vmax.xlane.f32.xlu1 %v2758_v9  ;;  %2202 = vmax.xlane.f32.xlu0 %v2201_v14  ;;  %v3887_v17 = vmax.f32 %v3883_v8, %v3885_v12  ;;  %v3306_v24 = vpop.permute.xlu0 %3305  ;;  %v3872_v26 = vpop.permute.xlu1 %3871 }
 0x2d5   :  { %v3316_v25 = vadd.f32 %v3315_v60, %v3306_v24  ;;  %v3882_v27 = vadd.f32 %v3881_v61, %v3872_v26 }
 0x2d6   :  { %v6675_v19 = vadd.f32 %v3321_v16, %v2174_v63  ;;  %v6679_v22 = vadd.f32 %v3887_v17, %v2174_v63 }
 0x2d7   :  { %v3318_v28 = vmul.f32 0.2, %v3316_v25  ;;  %v3884_v29 = vmul.f32 0.2, %v3882_v27 }
 0x2d8   :  { %2762 = vmax.xlane.f32.xlu0 %v2761_v18  ;;  %v3327_v20 = vsel %vm2197_vm4, %v6675_v19, -inf  ;;  %v3893_v23 = vsel %vm2197_vm4, %v6679_v22, -inf }
 0x2d9   :  { %v3320_v30 = vmax.f32 %v3316_v25, %v3318_v28  ;;  %v3886_v31 = vmax.f32 %v3882_v27, %v3884_v29 }
 0x2db   :  { %v3322_v32 = vadd.f32 %v3320_v30, %v2173_v50  ;;  %v3888_v34 = vadd.f32 %v3886_v31, %v2173_v50 }
 0x2dc   :  { %3328 = vmax.xlane.f32.xlu0 %v3327_v20 }
 0x2dd   :  { %v3324_v33 = vsel %vm2197_vm4, %v3322_v32, -inf  ;;  %v3890_v35 = vsel %vm2197_vm4, %v3888_v34, -inf }
 0x2e0   :  { %3894 = vmax.xlane.f32.xlu0 %v3893_v23 }
 0x2e5   :  { %2780 = vrot.lane.b32.xlu1 %v6630_v54, %s6380_s5 }
 0x309   :  { %3325 = vmax.xlane.f32.xlu1 %v3324_v33 }
 0x30d   :  { %3891 = vmax.xlane.f32.xlu1 %v3890_v35 }
 0x31e   :  { %3346 = vrot.lane.b32.xlu1 %v6630_v54, %s6381_s25 }
 0x35d   :  { %v2200_v36 = vpop.xlane.xlu1 %2199 }
 0x35e   :  { %v2204_v37 = vsub.f32 %v2195_v59, %v2200_v36 }
 0x360   :  { %v2206_v38 = vmul.f32 1.442695, %v2204_v37 }
 0x361   :  { %v2760_v39 = vpop.xlane.xlu1 %2759  ;;  %v2203_v40 = vpop.xlane.xlu0 %2202 }
 0x362   :  { %6200 = vpow2.f32 %v2206_v38  ;;  %v2764_v41 = vsub.f32 %v2756_v5, %v2760_v39  ;;  %v2205_v42 = vsub.f32 %v2196_v10, %v2203_v40 }
 0x364   :  { %v2766_v43 = vmul.f32 1.442695, %v2764_v41  ;;  %v2208_v44 = vmul.f32 1.442695, %v2205_v42 }
 0x365   :  { %v2763_v45 = vpop.xlane.xlu0 %2762  ;;  %v2781_v59 = vpop.permute.xlu1 %2780 }
 0x366   :  { %6202 = vpow2.f32 %v2766_v43  ;;  %v2765_v46 = vsub.f32 %v2757_v15, %v2763_v45 }
 0x367   :  { %6204 = vpow2.f32 %v2208_v44 }
 0x368   :  { %v2768_v47 = vmul.f32 1.442695, %v2765_v46 }
 0x369   :  { %v3329_v58 = vpop.xlane.xlu0 %3328 }
 0x36a   :  { %6206 = vpow2.f32 %v2768_v47  ;;  %v3331_v60 = vsub.f32 %v6675_v19, %v3329_v58 }
 0x36c   :  { %v6201_v48 = vpop.eup %6200  ;;  %v3334_v2 = vmul.f32 1.442695, %v3331_v60 }
 0x36d   :  { %v2210_v49 = vsel %vm2197_vm4, %v6201_v48, 0.0  ;;  %v3895_v63 = vpop.xlane.xlu0 %3894 }
 0x36e   :  { %2211 = vadd.xlane.f32.xlu1 %v2210_v49  ;;  %v3897_v3 = vsub.f32 %v6679_v22, %v3895_v63  ;;  %v2793_v22 = vand.u32 4294901760, %v2781_v59 }
 0x370   :  { %v6690_v50 = vpop.eup %6202  ;;  %v6730_v24 = vsub.f32 %v2781_v59, %v2793_v22 }
 0x371   :  { %v6692_v51 = vpop.eup %6204  ;;  %v2770_v53 = vsel %vm2197_vm4, %v6690_v50, 0.0 }
 0x372   :  { %2771 = vadd.xlane.f32.xlu1 %v2770_v53  ;;  %v2213_v55 = vsel %vm2197_vm4, %v6692_v51, 0.0  ;;  %v2882_v28 = vand.u32 4294901760, %v6730_v24 }
 0x373   :  { %2214 = vadd.xlane.f32.xlu0 %v2213_v55 }
 0x374   :  { %v6698_v56 = vpop.eup %6206  ;;  %v2883_v38 = vsub.f32 %v6730_v24, %v2882_v28 }
 0x375   :  { %v2773_v57 = vsel %vm2197_vm4, %v6698_v56, 0.0 }
 0x377   :  { %2774 = vadd.xlane.f32.xlu0 %v2773_v57 }
 0x383   :  { %3912 = vrot.lane.b32.xlu1 %v6630_v54, %s6382_s26  ;;  %v3900_v54 = vmul.f32 1.442695, %v3897_v3 }
 0x38d   :  { %2782 = vrot.lane.b32.xlu0 %v6626_v52, %s6380_s5 }
 0x396   :  { %v3326_v61 = vpop.xlane.xlu1 %3325 }
 0x397   :  { %v3330_v0 = vsub.f32 %v3322_v32, %v3326_v61 }
 0x399   :  { %v3332_v1 = vmul.f32 1.442695, %v3330_v0 }
 0x39a   :  { %v3892_v4 = vpop.xlane.xlu1 %3891 }
 0x39b   :  { %6208 = vpow2.f32 %v3332_v1  ;;  %v3896_v5 = vsub.f32 %v3888_v34, %v3892_v4 }
 0x39c   :  { %6210 = vpow2.f32 %v3334_v2 }
 0x39d   :  { %v3898_v6 = vmul.f32 1.442695, %v3896_v5 }
 0x39e   :  { %v6728_v17 = vpop.permute.xlu1 %3346 }
 0x39f   :  { %6212 = vpow2.f32 %v3898_v6 }
 0x3a0   :  { %6214 = vpow2.f32 %v3900_v54 }
 0x3a5   :  { %v6708_v8 = vpop.eup %6208 }
 0x3a6   :  { %v3336_v10 = vsel %vm2197_vm4, %v6708_v8, 0.0  ;;  %v6712_v11 = vpop.eup %6210 }
 0x3a7   :  { %3337 = vadd.xlane.f32.xlu1 %v3336_v10  ;;  %v3339_v14 = vsel %vm2197_vm4, %v6712_v11, 0.0 }
 0x3a9   :  { %v6714_v12 = vpop.eup %6212 }
 0x3aa   :  { %v3902_v9 = vsel %vm2197_vm4, %v6714_v12, 0.0  ;;  %v6720_v15 = vpop.eup %6214 }
 0x3ab   :  { %3903 = vadd.xlane.f32.xlu1 %v3902_v9  ;;  %v3905_v16 = vsel %vm2197_vm4, %v6720_v15, 0.0 }
 0x3ac   :  { %3340 = vadd.xlane.f32.xlu0 %v3339_v14 }
 0x3b0   :  { %3906 = vadd.xlane.f32.xlu0 %v3905_v16  ;;  %v3359_v16 = vand.u32 4294901760, %v6728_v17 }
 0x3bc   :  { %3914 = vrot.lane.b32.xlu1 %v6626_v52, %s6382_s26 }
 0x3c6   :  { %3348 = vrot.lane.b32.xlu0 %v6626_v52, %s6381_s25 }
 0x3fb   :  { %v2212_v18 = vpop.xlane.xlu1 %2211 }
 0x3fc   :  { %6216 = vrcp.f32 %v2212_v18 }
 0x3ff   :  { %v2772_v19 = vpop.xlane.xlu1 %2771 }
 0x400   :  { %6218 = vrcp.f32 %v2772_v19  ;;  %v2215_v20 = vpop.xlane.xlu0 %2214 }
 0x401   :  { %6220 = vrcp.f32 %v2215_v20 }
 0x404   :  { %v2775_v23 = vpop.xlane.xlu0 %2774 }
 0x405   :  { %6222 = vrcp.f32 %v2775_v23  ;;  %v6788_v23 = vsub.f32 %v6728_v17, %v3359_v16 }
 0x406   :  { %v6217_v25 = vpop.eup %6216 }
 0x407   :  { %v2218_v26 = vmul.f32 %v6217_v25, %v6201_v48 }
 0x408   :  { %v2783_v27 = vpop.permute.xlu0 %2782 }
 0x409   :  { %v2796_v29 = vand.u32 4294901760, %v2783_v27  ;;  %v2221_v52 = vsel %vm2197_vm4, %v2218_v26, 0 }
 0x40a   :  { %v6219_v30 = vpop.eup %6218  ;;  %v6734_v31 = vand.u32 4294901760, %v2221_v52 }
 0x40b   :  { %v6221_v32 = vpop.eup %6220  ;;  %v2778_v33 = vmul.f32 %v6219_v30, %v6690_v50  ;;  %v6737_v34 = vpack.c.bf16 %v2796_v29, %v2793_v22  ;;  %v2888_v35 = vsub.f32 %v2783_v27, %v2796_v29  ;;  %v2884_v50 = vand.u32 4294901760, %v2883_v38 }
 0x40c   :  { %v2219_v36 = vmul.f32 %v6221_v32, %v6692_v51  ;;  %v2294_v37 = vsub.f32 %v2221_v52, %v6734_v31  ;;  %v3448_v29 = vand.u32 4294901760, %v6788_v23 }
 0x40d   :  { %v2889_v39 = vand.u32 4294901760, %v2888_v35  ;;  %5962 = vmatprep.subr.bf16.mxu1 %v6737_v34  ;;  %v2787_v40 = vsel %vm2197_vm4, %v2778_v33, 0  ;;  %v5969_v6 = vpack.c.bf16 %v2888_v35, %v6730_v24 }
 0x40e   :  { %5964 = vmatpush3.bf16.msra.mxu1 %v6737_v34  ;;  %v2295_v41 = vand.u32 4294901760, %v2294_v37  ;;  %v2224_v42 = vsel %vm2197_vm4, %v2219_v36, 0  ;;  %v6748_v43 = vand.u32 4294901760, %v2787_v40 }
 0x40f   :  { %v6223_v44 = vpop.eup %6222  ;;  %v2890_v45 = vsub.f32 %v2888_v35, %v2889_v39  ;;  %v6750_v46 = vand.u32 4294901760, %v2224_v42 }
 0x410   :  { %v2779_v47 = vmul.f32 %v6223_v44, %v6698_v56  ;;  %v2296_v48 = vsub.f32 %v2294_v37, %v2295_v41  ;;  %v2860_v49 = vsub.f32 %v2787_v40, %v6748_v43 }
 0x411   :  { %v2891_v51 = vand.u32 4294901760, %v2890_v45  ;;  %v2304_v53 = vsub.f32 %v2224_v42, %v6750_v46 }
 0x412   :  { %v2297_v55 = vand.u32 4294901760, %v2296_v48  ;;  %v2861_v57 = vand.u32 4294901760, %v2860_v49  ;;  %v2790_v58 = vsel %vm2197_vm4, %v2779_v47, 0 }
 0x413   :  { %v5965_v59 = vpack.c.bf16 %v2891_v51, %v2884_v50  ;;  %v2305_v60 = vand.u32 4294901760, %v2304_v53  ;;  %v6756_v61 = vand.u32 4294901760, %v2790_v58 }
 0x414   :  { %5545 = vmatprep.mubr.f32.mxu0 %v2297_v55  ;;  %v2862_v63 = vsub.f32 %v2860_v49, %v2861_v57 }
 0x415   :  { %5966 = vmatprep.subr.bf16.mxu1 %v5965_v59  ;;  %v2306_v0 = vsub.f32 %v2304_v53, %v2305_v60  ;;  %v2870_v56 = vsub.f32 %v2790_v58, %v6756_v61 }
 0x416   :  { %v2863_v1 = vand.u32 4294901760, %v2862_v63 }
 0x417   :  { %v2307_v2 = vand.u32 4294901760, %v2306_v0  ;;  %v2871_v3 = vand.u32 4294901760, %v2870_v56 }
 0x418   :  { %5587 = vmatprep.mubr.f32.mxu1 %v2863_v1 }
 0x419   :  { %5546 = vmatmul.mubr.f32.vlgmr.msra.gmra.mrb[4].mxu0 %v2307_v2  ;;  %v2872_v4 = vsub.f32 %v2870_v56, %v2871_v3 }
 0x41a   :  { %5944 = vmatpush3.bf16.msra.mxu0 %v6651_v21  ;;  %5552 = vmatprep.mubr.f32.mxu0 %v6734_v31  ;;  %v5977_v21 = vpack.c.bf16 %v2889_v39, %v2882_v28 }
 0x41b   :  { %5946 = vmatprep.subr.bf16.mxu0 %v6644_v7  ;;  %v2873_v5 = vand.u32 4294901760, %v2872_v4 }
 0x41d   :  { %5588 = vmatmul.mubr.f32.vlgmr.msra.gmra.mrb[6].mxu1 %v2873_v5 }
 0x41e   :  { %5968 = vmatpush3.bf16.msra.mxu1 %v5965_v59  ;;  %5594 = vmatprep.mubr.f32.mxu1 %v6748_v43 }
 0x41f   :  { %5970 = vmatprep.subr.bf16.mxu1 %v5969_v6 }
 0x421   :  { %5553 = vmatmul.mubr.f32.vlgmr.msra.gmra.mrb[4].mxu0 %v6750_v46 }
 0x422   :  { %5948 = vmatpush3.bf16.msra.mxu0 %v6644_v7  ;;  %5559 = vmatprep.mubr.f32.mxu0 %v2294_v37  ;;  %v3913_v7 = vpop.permute.xlu1 %3912 }
 0x423   :  { %5950 = vmatprep.subr.bf16.mxu0 %v6639_v62  ;;  %v3925_v10 = vand.u32 4294901760, %v3913_v7 }
 0x425   :  { %5595 = vmatmul.mubr.f32.vlgmr.msra.gmra.mrb[6].mxu1 %v6756_v61  ;;  %v6779_v14 = vsub.f32 %v3913_v7, %v3925_v10 }
 0x426   :  { %5972 = vmatpush3.bf16.msra.mxu1 %v5969_v6  ;;  %5601 = vmatprep.mubr.f32.mxu1 %v2860_v49 }
 0x427   :  { %5974 = vmatprep.subr.bf16.mxu1 %v6737_v34  ;;  %v4014_v19 = vand.u32 4294901760, %v6779_v14 }
 0x429   :  { %5560 = vmatmul.mubr.f32.vlgmr.msra.gmra.mrb[4].mxu0 %v2304_v53  ;;  %v4015_v27 = vsub.f32 %v6779_v14, %v4014_v19 }
 0x42a   :  { %5952 = vmatpush3.bf16.msra.mxu0 %v6639_v62  ;;  %5566 = vmatprep.mubr.f32.mxu0 %v2295_v41  ;;  %v3449_v41 = vsub.f32 %v6788_v23, %v3448_v29 }
 0x42b   :  { %5954 = vmatprep.subr.bf16.mxu0 %v6648_v13  ;;  %v4016_v38 = vand.u32 4294901760, %v4015_v27 }
 0x42c   :  { %v3450_v53 = vand.u32 4294901760, %v3449_v41  ;;  %v4470_v41 = vld [vmem:[#allocation8 + $0x10] sm:$0xff] }
 0x42d   :  { %5602 = vmatmul.mubr.f32.vlgmr.msra.gmra.mrb[6].mxu1 %v2870_v56 }
 0x42e   :  { %5976 = vmatpush3.bf16.msra.mxu1 %v6737_v34  ;;  %5608 = vmatprep.mubr.f32.mxu1 %v2861_v57 }
 0x42f   :  { %5978 = vmatprep.subr.bf16.mxu1 %v5977_v21 }
 0x431   :  { %5567 = vmatmul.mubr.f32.vlgmr.msra.gmra.mrb[4].mxu0 %v2305_v60 }
 0x432   :  { %5956 = vmatpush3.bf16.msra.mxu0 %v6648_v13  ;;  %5573 = vmatprep.mubr.f32.mxu0 %v6734_v31 }
 0x433   :  { %5958 = vmatprep.subr.bf16.mxu0 %v6639_v62 }
 0x434   :  { %v3338_v54 = vpop.xlane.xlu1 %3337 }
 0x435   :  { %6224 = vrcp.f32 %v3338_v54  ;;  %5609 = vmatmul.mubr.f32.vlgmr.msra.gmra.mrb[6].mxu1 %v2871_v3 }
 0x436   :  { %5980 = vmatpush3.bf16.msra.mxu1 %v5977_v21  ;;  %5615 = vmatprep.mubr.f32.mxu1 %v6748_v43 }
 0x437   :  { %5982 = vmatprep.subr.bf16.mxu1 %v6737_v34 }
 0x438   :  { %v3904_v9 = vpop.xlane.xlu1 %3903 }
 0x439   :  { %6226 = vrcp.f32 %v3904_v9  ;;  %5574 = vmatmul.mubr.f32.vlgmr.msra.gmra.mrb[4].mxu0 %v6750_v46  ;;  %v3341_v13 = vpop.xlane.xlu0 %3340 }
 0x43a   :  { %5960 = vmatpush3.bf16.msra.mxu0 %v6639_v62  ;;  %6228 = vrcp.f32 %v3341_v13  ;;  %5580 = vmatprep.mubr.f32.mxu0 %v6734_v31 }
 0x43c   :  { %v3915_v18 = vpop.permute.xlu1 %3914 }
 0x43d   :  { %v3928_v20 = vand.u32 4294901760, %v3915_v18  ;;  %5616 = vmatmul.mubr.f32.vlgmr.msra.gmra.mrb[6].mxu1 %v6756_v61  ;;  %v3907_v22 = vpop.xlane.xlu0 %3906 }
 0x43e   :  { %5984 = vmatpush3.bf16.msra.mxu1 %v6737_v34  ;;  %6230 = vrcp.f32 %v3907_v22  ;;  %5622 = vmatprep.mubr.f32.mxu1 %v6748_v43 }
 0x43f   :  { %v6225_v24 = vpop.eup %6224  ;;  %v6792_v62 = vpack.c.bf16 %v3928_v20, %v3925_v10  ;;  %v6794_v25 = vsub.f32 %v3915_v18, %v3928_v20 }
 0x440   :  { %v3344_v26 = vmul.f32 %v6225_v24, %v6708_v8 }
 0x441   :  { %v4021_v28 = vand.u32 4294901760, %v6794_v25  ;;  %5581 = vmatmul.mubr.f32.vlgmr.msra.gmra.mrb[4].mxu0 %v6750_v46  ;;  %v3349_v17 = vpop.permute.xlu0 %3348  ;;  %6010 = vmatprep.subr.bf16.mxu1 %v6792_v62  ;;  %v6017_v7 = vpack.c.bf16 %v6794_v25, %v6779_v14 }
 0x442   :  { %v3362_v52 = vand.u32 4294901760, %v3349_v17  ;;  %v3353_v30 = vsel %vm2197_vm4, %v3344_v26, 0 }
 0x443   :  { %v6227_v31 = vpop.eup %6226  ;;  %v4022_v8 = vsub.f32 %v6794_v25, %v4021_v28  ;;  %v6808_v32 = vand.u32 4294901760, %v3353_v30  ;;  %v6025_v10 = vpack.c.bf16 %v4021_v28, %v4014_v19 }
 0x444   :  { %v6229_v33 = vpop.eup %6228  ;;  %v3910_v34 = vmul.f32 %v6227_v31, %v6714_v12  ;;  %v6811_v35 = vpack.c.bf16 %v3362_v52, %v3359_v16  ;;  %v6813_v36 = vsub.f32 %v3349_v17, %v3362_v52 }
 0x445   :  { %v3345_v37 = vmul.f32 %v6229_v33, %v6712_v11  ;;  %5623 = vmatmul.mubr.f32.vlgmr.msra.gmra.mrb[6].mxu1 %v6756_v61  ;;  %v4023_v39 = vand.u32 4294901760, %v4022_v8  ;;  %v3426_v40 = vsub.f32 %v3353_v30, %v6808_v32  ;;  %v4468_v8 = vld [vmem:[#allocation8] sm:$0xff] }
 0x446   :  { %v3455_v42 = vand.u32 4294901760, %v6813_v36  ;;  %6012 = vmatpush3.bf16.msra.mxu1 %v6792_v62  ;;  %5986 = vmatprep.subr.bf16.mxu0 %v6811_v35  ;;  %v3919_v12 = vsel %vm2197_vm4, %v3910_v34, 0  ;;  %v5993_v5 = vpack.c.bf16 %v6813_v36, %v6788_v23  ;;  %v4486_v33 = vand.u32 4294901760, %v4468_v8 }
 0x447   :  { %5988 = vmatpush3.bf16.msra.mxu0 %v6811_v35  ;;  %v6013_v11 = vpack.c.bf16 %v4023_v39, %v4016_v38  ;;  %v3427_v43 = vand.u32 4294901760, %v3426_v40  ;;  %v3356_v44 = vsel %vm2197_vm4, %v3345_v37, 0  ;;  %v6827_v45 = vand.u32 4294901760, %v3919_v12 }
 0x448   :  { %v6231_v46 = vpop.eup %6230  ;;  %v3456_v47 = vsub.f32 %v6813_v36, %v3455_v42  ;;  %v6830_v48 = vand.u32 4294901760, %v3356_v44  ;;  %v6001_v54 = vpack.c.bf16 %v3455_v42, %v3448_v29  ;;  %v4576_v37 = vsub.f32 %v4468_v8, %v4486_v33  ;;  %v4471_v42 = vld [vmem:[#allocation8 + $0x18] sm:$0xff] }
 0x449   :  { %v3911_v49 = vmul.f32 %v6231_v46, %v6720_v15  ;;  %6014 = vmatprep.subr.bf16.mxu1 %v6013_v11  ;;  %v3428_v50 = vsub.f32 %v3426_v40, %v3427_v43  ;;  %v3992_v51 = vsub.f32 %v3919_v12, %v6827_v45 }
 0x44a   :  { %v3457_v55 = vand.u32 4294901760, %v3456_v47  ;;  %v3436_v57 = vsub.f32 %v3356_v44, %v6830_v48  ;;  %v4577_v44 = vand.u32 4294901760, %v4576_v37 }
 0x44b   :  { %v3429_v58 = vand.u32 4294901760, %v3428_v50  ;;  %v3993_v59 = vand.u32 4294901760, %v3992_v51  ;;  %v3922_v60 = vsel %vm2197_vm4, %v3911_v49, 0 }
 0x44c   :  { %v5989_v61 = vpack.c.bf16 %v3457_v55, %v3450_v53  ;;  %v3437_v63 = vand.u32 4294901760, %v3436_v57  ;;  %v4001_v0 = vand.u32 4294901760, %v3922_v60  ;;  %v4578_v50 = vsub.f32 %v4576_v37, %v4577_v44 }
 0x44d   :  { %5629 = vmatprep.mubr.f32.mxu0 %v3429_v58  ;;  %v3994_v56 = vsub.f32 %v3992_v51, %v3993_v59 }
 0x44e   :  { %5990 = vmatprep.subr.bf16.mxu0 %v5989_v61  ;;  %v3438_v1 = vsub.f32 %v3436_v57, %v3437_v63  ;;  %v4002_v15 = vsub.f32 %v3922_v60, %v4001_v0  ;;  %v4579_v60 = vand.u32 4294901760, %v4578_v50 }
 0x44f   :  { %v3995_v2 = vand.u32 4294901760, %v3994_v56 }
 0x450   :  { %v3439_v3 = vand.u32 4294901760, %v3438_v1  ;;  %v4003_v4 = vand.u32 4294901760, %v4002_v15 }
 0x451   :  { %5671 = vmatprep.mubr.f32.mxu1 %v3995_v2 }
 0x452   :  { %5630 = vmatmul.mubr.f32.vlgmr.msra.gmra.mrb[6].mxu0 %v3439_v3  ;;  %v4004_v6 = vsub.f32 %v4002_v15, %v4003_v4 }
 0x453   :  { %5992 = vmatpush3.bf16.msra.mxu0 %v5989_v61  ;;  %5636 = vmatprep.mubr.f32.mxu0 %v6808_v32 }
 0x454   :  { %5994 = vmatprep.subr.bf16.mxu0 %v5993_v5  ;;  %v4005_v21 = vand.u32 4294901760, %v4004_v6 }
 0x456   :  { %5672 = vmatmul.mubr.f32.vlgmr.msra.gmra.mrb[8].mxu1 %v4005_v21 }
 0x457   :  { %6016 = vmatpush3.bf16.msra.mxu1 %v6013_v11  ;;  %5678 = vmatprep.mubr.f32.mxu1 %v6827_v45  ;;  %v4492_v11 = vand.u32 4294901760, %v4470_v41 }
 0x458   :  { %6018 = vmatprep.subr.bf16.mxu1 %v6017_v7 }
 0x45a   :  { %5637 = vmatmul.mubr.f32.vlgmr.msra.gmra.mrb[6].mxu0 %v6830_v48 }
 0x45b   :  { %5996 = vmatpush3.bf16.msra.mxu0 %v5993_v5  ;;  %5643 = vmatprep.mubr.f32.mxu0 %v3426_v40 }
 0x45c   :  { %5998 = vmatprep.subr.bf16.mxu0 %v6811_v35 }
 0x45e   :  { %5679 = vmatmul.mubr.f32.vlgmr.msra.gmra.mrb[8].mxu1 %v4001_v0 }
 0x45f   :  { %6020 = vmatpush3.bf16.msra.mxu1 %v6017_v7  ;;  %5685 = vmatprep.mubr.f32.mxu1 %v3992_v51  ;;  %v4590_v51 = vsub.f32 %v4470_v41, %v4492_v11 }
 0x460   :  { %6022 = vmatprep.subr.bf16.mxu1 %v6792_v62 }
 0x461   :  { %v4591_v61 = vand.u32 4294901760, %v4590_v51 }
 0x462   :  { %5644 = vmatmul.mubr.f32.vlgmr.msra.gmra.mrb[6].mxu0 %v3436_v57 }
 0x463   :  { %6000 = vmatpush3.bf16.msra.mxu0 %v6811_v35  ;;  %5650 = vmatprep.mubr.f32.mxu0 %v3427_v43  ;;  %v4495_v43 = vand.u32 4294901760, %v4471_v42 }
 0x464   :  { %6002 = vmatprep.subr.bf16.mxu0 %v6001_v54 }
 0x465   :  { %v6873_v49 = vpack.c.bf16 %v4495_v43, %v4492_v11  ;;  %v4597_v58 = vsub.f32 %v4471_v42, %v4495_v43  ;;  %v5042_v11 = vld [vmem:[%s6922_s7] ss:$0 sm:$0xff] }
 0x466   :  { %5686 = vmatmul.mubr.f32.vlgmr.msra.gmra.mrb[8].mxu1 %v4002_v15  ;;  %v4592_v15 = vsub.f32 %v4590_v51, %v4591_v61 }
 0x467   :  { %6024 = vmatpush3.bf16.msra.mxu1 %v6792_v62  ;;  %5692 = vmatprep.mubr.f32.mxu1 %v3993_v59  ;;  %v4598_v56 = vand.u32 4294901760, %v4597_v58  ;;  %v6053_v7 = vpack.c.bf16 %v4597_v58, %v4590_v51 }
 0x468   :  { %6026 = vmatprep.subr.bf16.mxu1 %v6025_v10 }
 0x469   :  { %v4599_v3 = vsub.f32 %v4597_v58, %v4598_v56 }
 0x46a   :  { %5651 = vmatmul.mubr.f32.vlgmr.msra.gmra.mrb[6].mxu0 %v3437_v63 }
 0x46b   :  { %6004 = vmatpush3.bf16.msra.mxu0 %v6001_v54  ;;  %5657 = vmatprep.mubr.f32.mxu0 %v6808_v32  ;;  %v4600_v5 = vand.u32 4294901760, %v4599_v3 }
 0x46c   :  { %6006 = vmatprep.subr.bf16.mxu0 %v6811_v35 }
 0x46e   :  { %5693 = vmatmul.mubr.f32.vlgmr.msra.gmra.mrb[8].mxu1 %v4003_v4  ;;  %v4593_v4 = vand.u32 4294901760, %v4592_v15 }
 0x46f   :  { %6028 = vmatpush3.bf16.msra.mxu1 %v6025_v10  ;;  %5699 = vmatprep.mubr.f32.mxu1 %v6827_v45  ;;  %v6069_v10 = vpack.c.bf16 %v4598_v56, %v4591_v61 }
 0x470   :  { %6030 = vmatprep.subr.bf16.mxu1 %v6792_v62  ;;  %v6045_v6 = vpack.c.bf16 %v4600_v5, %v4593_v4 }
 0x472   :  { %5658 = vmatmul.mubr.f32.vlgmr.msra.gmra.mrb[6].mxu0 %v6830_v48 }
 0x473   :  { %6008 = vmatpush3.bf16.msra.mxu0 %v6811_v35  ;;  %5664 = vmatprep.mubr.f32.mxu0 %v6808_v32  ;;  %v4469_v32 = vld [vmem:[#allocation8 + $0x8] sm:$0xff] }
 0x474   :  { %v4489_v34 = vand.u32 4294901760, %v4469_v32 }
 0x476   :  { %5700 = vmatmul.mubr.f32.vlgmr.msra.gmra.mrb[8].mxu1 %v4001_v0  ;;  %v6869_v36 = vpack.c.bf16 %v4489_v34, %v4486_v33  ;;  %v4583_v38 = vsub.f32 %v4469_v32, %v4489_v34 }
 0x477   :  { %6032 = vmatpush3.bf16.msra.mxu1 %v6792_v62  ;;  %5706 = vmatprep.mubr.f32.mxu1 %v6827_v45 }
 0x478   :  { %6034 = vmatprep.subr.bf16.mxu0 %v6869_v36  ;;  %v4584_v46 = vand.u32 4294901760, %v4583_v38  ;;  %v6049_v21 = vpack.c.bf16 %v4583_v38, %v4576_v37 }
 0x47a   :  { %5665 = vmatmul.mubr.f32.vlgmr.msra.gmra.mrb[6].mxu0 %v6830_v48  ;;  %v4585_v57 = vsub.f32 %v4583_v38, %v4584_v46  ;;  %v6065_v54 = vpack.c.bf16 %v4584_v46, %v4577_v44 }
 0x47b   :  { %6036 = vmatpush3.bf16.msra.mxu0 %v6869_v36 }
 0x47c   :  { %6038 = vmatprep.subr.bf16.mxu0 %v6873_v49 }
 0x47e   :  { %5707 = vmatmul.mubr.f32.vlgmr.msra.gmra.mrb[8].mxu1 %v4001_v0  ;;  %v4586_v0 = vand.u32 4294901760, %v4585_v57 }
 0x47f   :  { %6040 = vmatpush3.bf16.msra.mxu0 %v6873_v49 }
 0x480   :  { %v6041_v2 = vpack.c.bf16 %v4586_v0, %v4579_v60 }
 0x482   :  { %6042 = vmatprep.subr.bf16.mxu0 %v6041_v2 }
 0x514   :  { %v6863_v9 = vpop.f32.mrb[4].mxu0 }
 0x515   :  { %v6865_v14 = vpop.f32.mrb[5].mxu0  ;;  %vm2729_vm12 = vcmp.gt.f32.partialorder %v6863_v9, 0.0 }
 0x516   :  { %vm2728_vm13 = vcmp.gt.f32.partialorder %v6865_v14, 0.0 }
 0x518   :  { %v5624_v13 = vpop.f32.mrb[6].mxu1 }
 0x519   :  { %v3298_v16 = vmul.f32 1.442695, %v5624_v13  ;;  %v3284_v18 = vpop.f32.mrb[7].mxu1  ;;  %vm3295_vm5 = vcmp.gt.f32.partialorder %v5624_v13, 0.0 }
 0x51a   :  { %v3296_v19 = vmul.f32 1.442695, %v3284_v18  ;;  %vm3294_vm6 = vcmp.gt.f32.partialorder %v3284_v18, 0.0 }
 0x51b   :  { %6232 = vpow2.f32 %v3298_v16  ;;  %v2730_v16 = vmul.f32 1.442695, %v6865_v14 }
 0x51c   :  { %6234 = vpow2.f32 %v3296_v19 }
 0x525   :  { %v6233_v20 = vpop.eup %6232 }
 0x526   :  { %v6235_v22 = vpop.eup %6234  ;;  %v5037_v23 = vadd.f32 -1.0, %v6233_v20 }
 0x527   :  { %v5036_v24 = vadd.f32 -1.0, %v6235_v22 }
 0x528   :  { %v3303_v62 = vsel %vm3295_vm5, %v5624_v13, %v5037_v23  ;;  %v2732_v13 = vmul.f32 1.442695, %v6863_v9 }
 0x529   :  { %4440 = vrot.lane.b32.xlu1 %v3303_v62, %s6369_s18  ;;  %v3302_v25 = vsel %vm3294_vm6, %v3284_v18, %v5036_v24 }
 0x52a   :  { %4438 = vrot.lane.b32.xlu0 %v3302_v25, %s6369_s18 }
 0x54d   :  { %v5666_v26 = vpop.f32.mrb[6].mxu0 }
 0x54e   :  { %v3864_v27 = vmul.f32 1.442695, %v5666_v26  ;;  %v3850_v28 = vpop.f32.mrb[7].mxu0  ;;  %vm3861_vm7 = vcmp.gt.f32.partialorder %v5666_v26, 0.0 }
 0x54f   :  { %v3862_v17 = vmul.f32 1.442695, %v3850_v28  ;;  %vm3860_vm8 = vcmp.gt.f32.partialorder %v3850_v28, 0.0 }
 0x550   :  { %6236 = vpow2.f32 %v3864_v27 }
 0x551   :  { %6238 = vpow2.f32 %v3862_v17  ;;  %v5708_v29 = vpop.f32.mrb[8].mxu1 }
 0x552   :  { %v4430_v52 = vmul.f32 1.442695, %v5708_v29  ;;  %v4416_v30 = vpop.f32.mrb[9].mxu1  ;;  %vm4427_vm9 = vcmp.gt.f32.partialorder %v5708_v29, 0.0 }
 0x553   :  { %v4428_v31 = vmul.f32 1.442695, %v4416_v30  ;;  %vm4426_vm10 = vcmp.gt.f32.partialorder %v4416_v30, 0.0 }
 0x554   :  { %6240 = vpow2.f32 %v4430_v52 }
 0x555   :  { %6242 = vpow2.f32 %v4428_v31 }
 0x556   :  { %6244 = vpow2.f32 %v2732_v13 }
 0x557   :  { %6246 = vpow2.f32 %v2730_v16 }
 0x55a   :  { %v6237_v35 = vpop.eup %6236 }
 0x55b   :  { %v6239_v39 = vpop.eup %6238  ;;  %v5039_v40 = vadd.f32 -1.0, %v6237_v35 }
 0x55c   :  { %v5038_v12 = vadd.f32 -1.0, %v6239_v39 }
 0x55d   :  { %v3869_v45 = vsel %vm3861_vm7, %v5666_v26, %v5039_v40 }
 0x55e   :  { %v6241_v47 = vpop.eup %6240  ;;  %4448 = vrot.lane.b32.xlu1 %v3869_v45, %s6383_s27  ;;  %v3868_v48 = vsel %vm3860_vm8, %v3850_v28, %v5038_v12 }
 0x55f   :  { %v6243_v53 = vpop.eup %6242  ;;  %4446 = vrot.lane.b32.xlu0 %v3868_v48, %s6383_s27  ;;  %v5041_v55 = vadd.f32 -1.0, %v6241_v47 }
 0x560   :  { %v5040_v59 = vadd.f32 -1.0, %v6243_v53  ;;  %v6245_v18 = vpop.eup %6244 }
 0x561   :  { %v4435_v63 = vsel %vm4427_vm9, %v5708_v29, %v5041_v55  ;;  %v6247_v19 = vpop.eup %6246  ;;  %v5035_v23 = vadd.f32 -1.0, %v6245_v18 }
 0x562   :  { %4456 = vrot.lane.b32.xlu1 %v4435_v63, %s6384_s29  ;;  %v4434_v1 = vsel %vm4426_vm10, %v4416_v30, %v5040_v59  ;;  %v5034_v24 = vadd.f32 -1.0, %v6247_v19 }
 0x563   :  { %4454 = vrot.lane.b32.xlu0 %v4434_v1, %s6384_s29  ;;  %v2737_v26 = vsel %vm2729_vm12, %v6863_v9, %v5035_v23 }
 0x564   :  { %v2736_v27 = vsel %vm2728_vm13, %v6865_v14, %v5034_v24 }
 0x59b   :  { %v4441_v20 = vpop.permute.xlu1 %4440 }
 0x59c   :  { %v4439_v22 = vpop.permute.xlu0 %4438  ;;  %v4462_v28 = vsel %vm4460_vm11, %v2737_v26, %v4441_v20 }
 0x59d   :  { %v4461_v17 = vsel %vm4460_vm11, %v2736_v27, %v4439_v22 }
 0x5d0   :  { %v4449_v62 = vpop.permute.xlu1 %4448 }
 0x5d1   :  { %v4447_v25 = vpop.permute.xlu0 %4446  ;;  %v4464_v29 = vsel %vm2197_vm4, %v4462_v28, %v4449_v62 }
 0x5d2   :  { %v4463_v30 = vsel %vm2197_vm4, %v4461_v17, %v4447_v25 }
 0x5d4   :  { %v4457_v52 = vpop.permute.xlu1 %4456 }
 0x5d5   :  { %v4467_v31 = vsel %vm4465_vm14, %v4464_v29, %v4457_v52  ;;  %v4455_v8 = vpop.permute.xlu0 %4454 }
 0x5d6   :  { %v4483_v32 = vsel %vm93_vm0, %v4467_v31, 0  ;;  %v4466_v33 = vsel %vm4465_vm14, %v4463_v30, %v4455_v8 }
 0x5d7   :  { %v4564_v34 = vand.u32 4294901760, %v4483_v32  ;;  %v4480_v9 = vsel %vm93_vm0, %v4466_v33, 0 }
 0x5d8   :  { %v4554_v35 = vand.u32 4294901760, %v4480_v9 }
 0x5d9   :  { %v4565_v37 = vsub.f32 %v4483_v32, %v4564_v34 }
 0x5da   :  { %v4555_v38 = vsub.f32 %v4480_v9, %v4554_v35 }
 0x5db   :  { %v4566_v39 = vand.u32 4294901760, %v4565_v37 }
 0x5dc   :  { %v4556_v14 = vand.u32 4294901760, %v4555_v38 }
 0x5dd   :  { %v4567_v40 = vsub.f32 %v4565_v37, %v4566_v39 }
 0x5de   :  { %v4557_v41 = vsub.f32 %v4555_v38, %v4556_v14 }
 0x5df   :  { %v4568_v12 = vand.u32 4294901760, %v4567_v40 }
 0x5e0   :  { %v4558_v42 = vand.u32 4294901760, %v4557_v41 }
 0x5e2   :  { %5717 = vmatprep.mubr.f32.mxu0 %v4558_v42 }
 0x5e3   :  { %5718 = vmatmul.mubr.f32.vlgmr.msra.gmra.mrb[8].mxu0 %v4568_v12 }
 0x5e4   :  { %6044 = vmatpush3.bf16.msra.mxu0 %v6041_v2  ;;  %5728 = vmatprep.mubr.f32.mxu0 %v4554_v35 }
 0x5e5   :  { %6046 = vmatprep.subr.bf16.mxu0 %v6045_v6 }
 0x5e8   :  { %6048 = vmatpush3.bf16.msra.mxu0 %v6045_v6 }
 0x5e9   :  { %6050 = vmatprep.subr.bf16.mxu0 %v6049_v21 }
 0x5eb   :  { %5729 = vmatmul.mubr.f32.vlgmr.msra.gmra.mrb[8].mxu0 %v4564_v34 }
 0x5ec   :  { %6052 = vmatpush3.bf16.msra.mxu0 %v6049_v21  ;;  %5739 = vmatprep.mubr.f32.mxu0 %v4555_v38 }
 0x5ed   :  { %6054 = vmatprep.subr.bf16.mxu0 %v6053_v7 }
 0x5f0   :  { %6056 = vmatpush3.bf16.msra.mxu0 %v6053_v7 }
 0x5f1   :  { %6058 = vmatprep.subr.bf16.mxu0 %v6869_v36 }
 0x5f3   :  { %5740 = vmatmul.mubr.f32.vlgmr.msra.gmra.mrb[8].mxu0 %v4565_v37 }
 0x5f4   :  { %6060 = vmatpush3.bf16.msra.mxu0 %v6869_v36  ;;  %5750 = vmatprep.mubr.f32.mxu0 %v4556_v14 }
 0x5f5   :  { %6062 = vmatprep.subr.bf16.mxu0 %v6873_v49 }
 0x5f8   :  { %6064 = vmatpush3.bf16.msra.mxu0 %v6873_v49 }
 0x5f9   :  { %6066 = vmatprep.subr.bf16.mxu0 %v6065_v54 }
 0x5fb   :  { %5751 = vmatmul.mubr.f32.vlgmr.msra.gmra.mrb[8].mxu0 %v4566_v39 }
 0x5fc   :  { %6068 = vmatpush3.bf16.msra.mxu0 %v6065_v54  ;;  %5761 = vmatprep.mubr.f32.mxu0 %v4554_v35 }
 0x5fd   :  { %6070 = vmatprep.subr.bf16.mxu0 %v6069_v10 }
 0x600   :  { %6072 = vmatpush3.bf16.msra.mxu0 %v6069_v10 }
 0x601   :  { %6074 = vmatprep.subr.bf16.mxu0 %v6869_v36 }
 0x603   :  { %5762 = vmatmul.mubr.f32.vlgmr.msra.gmra.mrb[8].mxu0 %v4564_v34 }
 0x604   :  { %6076 = vmatpush3.bf16.msra.mxu0 %v6869_v36  ;;  %5772 = vmatprep.mubr.f32.mxu0 %v4554_v35 }
 0x605   :  { %6078 = vmatprep.subr.bf16.mxu0 %v6873_v49 }
 0x608   :  { %6080 = vmatpush3.bf16.msra.mxu0 %v6873_v49 }
 0x60b   :  { %5773 = vmatmul.mubr.f32.vlgmr.msra.gmra.mrb[8].mxu0 %v4564_v34 }
 0x6de   :  { %v5774_v43 = vpop.f32.mrb[8].mxu0 }
 0x6df   :  { %v6083_v44 = vadd.f32 %v5774_v43, %v5042_v11  ;;  %v5003_v45 = vpop.f32.mrb[9].mxu0 }
 0x6e0   :  { %v6084_v46 = vadd.f32 %v5042_v11, %v5003_v45 }
 0x6e1   :  { %5014 = vst.msk [vmem:[#allocation10 + $0x8] sm:$0xff] %vm93_vm0, %v6083_v44 }
 0x6e2   :  { %5013 = vst.msk [vmem:[#allocation10] sm:$0xff] %vm93_vm0, %v6084_v46 }
 0x6e3   :  { %6347 = shalt.err (!%p6344_p8)
}
 0x6e4   :  { %s6348_s13 = scalar_lea.hbm %s6923_s8, 256 }
 0x6e5   :  { %p6349_p9 = scmp.ne.s32.totalorder %s6923_s8, %s6348_s13  ;;  %p6352_p10 = scmp.lt.u32.totalorder %s6348_s13, %s6923_s8 }
 0x6e7   :  { %p6354_p11 = pnand %p6352_p10, %p6349_p9 }
 0x6e9   :  { %6357 = shalt.err (!%p6354_p11)
}
 0x6ea   :  { %5026 = dma.vmem_to_hbm [thread:$0]  %s5021_s9, 256, %s6923_s8, [#allocation4], %s6368_s17, %s6368_s17, %s6369_s18  }
 0x6eb   :  { %6364 = dma.done.wait [#allocation4], 256  }
 0x6ec   :  { %6365 = vsyncadd [#allocation4], 4294967040 }
 0x6ed   :  { %5030 = vsyncpa [#allocation3], 1 }
 0x6ee   :  { %5031 = vsyncpa [#allocation6], 1 }
 0x6ef   :  { %5032 = vsyncpa [#allocation9], 1 }
 0x6f0   :  { %5033 = vsyncpa [#allocation4], 1 }

</bundles_post_ra>
